<compile_context>
chip_gen: v6e
topology: v6e:2x2x1
jax: 0.10.0
libtpu: 0.0.40
codegen_flags: <defaults>
</compile_context>

<pallas_src>
from functools import partial

import jax
import jax.numpy as jnp
from jax.experimental import pallas as pl
from jax.experimental.pallas import tpu as pltpu

EPS = 1e-6  # same EPS as the VN nonlinearity implementation


def vn_deepset_kernel(a_ref, xfull_ref, wlin_ref, b_ref, wdir_ref, rsum_ref, out_ref,
                      *, negative_slope):
    """One row-tile of nodes. Layout: Fp = pad(3*C, 128), column index = v*C + c (v-major),
    columns 3C..Fp-1 are zero padding.

      a_ref    : (tile_n, Np)   bf16 adjacency-count rows for this node tile
      xfull_ref: (Np, Fp)       bf16 all node features (pooling source + residual/identity tiles)
      wlin_ref : (2*Fp, Fp)     bf16 [kron(I3, W_id^T); kron(I3, W_pool^T)] stacked (zero-padded)
      b_ref    : (1, Fp)        f32  (b_id + b_pool) tiled over the 3 vector slots
      wdir_ref : (Fp, Fp)       bf16 kron(I3, W_dir^T) (no bias)
      rsum_ref : (Fp, Fp)       bf16 kron(ones(3,3), I_C): sums the 3 vector components per
                                channel and broadcasts the result back over the 3 slots
      out_ref  : (tile_n, Fp)   f32
    """
    tile_n = out_ref.shape[0]
    row0 = pl.multiple_of(pl.program_id(0) * tile_n, tile_n)
    x_t = xfull_ref[pl.ds(row0, tile_n), :]                       # this tile's features (bf16)

    # scatter-sum pooling as a single (tile_n, Np) @ (Np, Fp) bf16 matmul, f32 accumulate.
    pooled = jnp.dot(a_ref[...], xfull_ref[...], preferred_element_type=jnp.float32)

    # identity + pooling linears fused into one K = 2*Fp matmul (lane-concat vs stacked weights).
    lhs = jnp.concatenate([x_t, pooled.astype(jnp.bfloat16)], axis=1)      # (tile_n, 2*Fp)
    y = jnp.dot(lhs, wlin_ref[...], preferred_element_type=jnp.float32) + b_ref[...]

    # VNLeakyReLU: direction map, then per-node <y, d> and |d|^2 over the 3 vector slots,
    # computed with ONE M-stacked matmul against the 0/1 reduction matrix.
    d = jnp.dot(y.astype(jnp.bfloat16), wdir_ref[...], preferred_element_type=jnp.float32)
    s = jnp.concatenate([y * d, d * d], axis=0).astype(jnp.bfloat16)       # (2*tile_n, Fp)
    red = jnp.dot(s, rsum_ref[...], preferred_element_type=jnp.float32)
    dot3, dnorm3 = red[:tile_n], red[tile_n:]

    den = dnorm3 + EPS
    inv = pl.reciprocal(den, approx=True)          # EUP slot
    inv = inv * (2.0 - den * inv)                  # one Newton-Raphson step -> ~f32 accuracy
    adj = y - (dot3 * inv) * d
    act = negative_slope * y + (1.0 - negative_slope) * jnp.where(dot3 >= 0.0, y, adj)

    # TODO(synk): nn.Dropout with p>0 / train mode not implemented (identity here).
    out_ref[...] = act + x_t.astype(jnp.float32)   # residual


def vn_deepset_layer(x, edges, params, *, negative_slope=0.2, tile_n=128):
    """x: (N, 3, C_in) f32, edges: (2, E) int32. Returns (output (N, 3, C_out), edges)."""
    N, V, Cin = x.shape
    Cout = params["W_id"].shape[0]
    if Cout != Cin:
        raise ValueError("residual=True requires out_channels == in_channels")
    if tile_n % 8 != 0:
        raise ValueError("tile_n must be a multiple of 8 (TPU sublane granularity)")

    F = V * Cin                                     # live lane width (3C)
    Fp = ((F + 127) // 128) * 128                   # lane-dense padded width
    num_tiles = pl.cdiv(N, tile_n)
    Np = num_tiles * tile_n                         # node axis padded to the tile size

    # ---- plain-JAX glue: dense adjacency counts and kron'ed / padded parameters -------------
    # A[i, j] = #{e : dst==i, src==j}.  Counts are small integers -> exact in bf16.
    # TODO(synk): pooling='mean'/'max' scatter reductions not implemented (sum only).
    e1, e2 = edges[0], edges[1]
    A = jnp.zeros((Np, Np), jnp.float32).at[e2, e1].add(1.0).astype(jnp.bfloat16)

    x2 = x.reshape(N, F).astype(jnp.float32)
    x2 = jnp.pad(x2, ((0, Np - N), (0, Fp - F))).astype(jnp.bfloat16)      # (Np, Fp) bf16

    f32 = jnp.float32
    eye3 = jnp.eye(V, dtype=f32)

    def pad2(m):
        return jnp.pad(m, ((0, Fp - F), (0, Fp - F)))

    wid_bd = pad2(jnp.kron(eye3, params["W_id"].T.astype(f32)))
    wpool_bd = pad2(jnp.kron(eye3, params["W_pool"].T.astype(f32)))
    wlin = jnp.concatenate([wid_bd, wpool_bd], axis=0).astype(jnp.bfloat16)      # (2Fp, Fp)
    wdir_bd = pad2(jnp.kron(eye3, params["W_dir"].T.astype(f32))).astype(jnp.bfloat16)
    rsum = pad2(jnp.kron(jnp.ones((V, V), f32), jnp.eye(Cout, dtype=f32))).astype(jnp.bfloat16)
    b_fused = jnp.pad(jnp.tile(params["b_id"] + params["b_pool"], V), (0, Fp - F))
    b_fused = b_fused.reshape(1, Fp).astype(f32)

    grid = (Np // tile_n,)

    out = pl.pallas_call(
        partial(vn_deepset_kernel, negative_slope=negative_slope),
        out_shape=jax.ShapeDtypeStruct((Np, Fp), jnp.float32),
        grid_spec=pltpu.PrefetchScalarGridSpec(
            num_scalar_prefetch=0,
            grid=grid,
            in_specs=[
                pl.BlockSpec((tile_n, Np), lambda i: (i, 0)),   # A rows for this node tile
                pl.BlockSpec((Np, Fp), lambda i: (0, 0)),       # full x (pool source + tiles)
                pl.BlockSpec((2 * Fp, Fp), lambda i: (0, 0)),   # stacked [W_id; W_pool] blocks
                pl.BlockSpec((1, Fp), lambda i: (0, 0)),        # fused bias
                pl.BlockSpec((Fp, Fp), lambda i: (0, 0)),       # kron(I3, W_dir^T)
                pl.BlockSpec((Fp, Fp), lambda i: (0, 0)),       # vector-sum matrix R
            ],
            out_specs=pl.BlockSpec((tile_n, Fp), lambda i: (i, 0)),
        ),
        compiler_params=pltpu.CompilerParams(
            dimension_semantics=("parallel",),
            vmem_limit_bytes=48 * 1024 * 1024,
        ),
    )(A, x2, wlin, b_fused, wdir_bd, rsum)

    return out[:N, :F].reshape(N, V, Cout), edges


def reference_forward(x, edges, params, *, negative_slope=0.2):
    """Pure-JAX reference mirroring the PyTorch forward.

    Matmul *operands* are rounded to bfloat16 (as fed to the TPU MXU by the kernel) and
    accumulated in float32, so kernel-vs-reference differences reduce to accumulation order
    plus rare rounding-boundary flips (<= a few 1e-3, covered by the test tolerance)."""
    f32 = jnp.float32
    q = lambda a: a.astype(jnp.bfloat16).astype(f32)     # emulate bf16 operand rounding
    N, V, C = x.shape
    e1, e2 = edges[0], edges[1]
    xq = q(x)
    identity = jnp.einsum("nvc,oc->nvo", xq, q(params["W_id"])) + params["b_id"]
    pooled = jnp.zeros((N, V, C), f32).at[e2].add(xq[e1])
    pooling = jnp.einsum("nvc,oc->nvo", q(pooled), q(params["W_pool"])) + params["b_pool"]
    y = identity + pooling
    d = jnp.einsum("nvc,oc->nvo", q(y), q(params["W_dir"]))
    dot = jnp.sum(q(y * d), axis=1, keepdims=True)
    dnorm = jnp.sum(q(d * d), axis=1, keepdims=True)
    adj = y - (dot / (dnorm + EPS)) * d
    act = negative_slope * y + (1.0 - negative_slope) * jnp.where(dot >= 0.0, y, adj)
    return act + xq


if __name__ == "__main__":
    N, V, C, DEG = 256, 3, 32, 16   # nodes, 3D vectors, channels (in == out for residual)
    key = jax.random.PRNGKey(0)
    k_x, k_wid, k_bid, k_wpool, k_bpool, k_wdir, k_src = jax.random.split(key, 7)

    s = 1.0 / jnp.sqrt(C)
    params = {
        "W_id":   jax.random.uniform(k_wid,   (C, C), jnp.float32, -s, s),
        "b_id":   jax.random.uniform(k_bid,   (C,),   jnp.float32, -s, s),
        "W_pool": jax.random.uniform(k_wpool, (C, C), jnp.float32, -s, s),
        "b_pool": jax.random.uniform(k_bpool, (C,),   jnp.float32, -s, s),
        "W_dir":  jax.random.uniform(k_wdir,  (C, C), jnp.float32, -s, s),  # bias=False
    }

    x = jax.random.normal(k_x, (N, V, C), jnp.float32)

    # Random graph: every node receives DEG incoming edges from random sources.
    dst = jnp.repeat(jnp.arange(N, dtype=jnp.int32), DEG)
    src = jax.random.randint(k_src, (N * DEG,), 0, N, dtype=jnp.int32)
    edges = jnp.stack([src, dst])                                   # (2, N*DEG) int32

    out, edges_out = vn_deepset_layer(x, edges, params, negative_slope=0.2, tile_n=128)
    out = jax.block_until_ready(out)

    ref = reference_forward(x, edges, params, negative_slope=0.2)
    assert out.shape == (N, V, C)
    # Tolerance covers rare bf16 rounding-boundary flips of intermediates between the MXU and
    # the emulating reference (typical max-abs-diff is ~1e-6; flips stay at a few 1e-3).
    assert jnp.allclose(out, ref, rtol=1e-2, atol=1e-2), "mismatch vs reference"

    print("KERNEL_OK")
</pallas_src>

<mosaic_0001>
module attributes {stable_mosaic.version = 11 : i64} {
  func.func @vn_deepset_kernel(%arg0: i32, %arg1: memref<128x256xbf16, #tpu.memory_space<vmem>>, %arg2: memref<256x128xbf16, #tpu.memory_space<vmem>>, %arg3: memref<256x128xbf16, #tpu.memory_space<vmem>>, %arg4: memref<1x128xf32, #tpu.memory_space<vmem>>, %arg5: memref<128x128xbf16, #tpu.memory_space<vmem>>, %arg6: memref<128x128xbf16, #tpu.memory_space<vmem>>, %arg7: memref<128x128xf32, #tpu.memory_space<vmem>>) attributes {dimension_semantics = [#tpu.dimension_semantics<parallel>], iteration_bounds = array<i64: 2>, scalar_prefetch = 0 : i64, scratch_operands = 0 : i64, tpu.core_type = #tpu.core_type<tc>, window_params = [{transform_indices = @transform_0, window_bounds = array<i64: 128, 256>}, {pipeline_mode = #tpu.pipeline_mode<synchronous>, transform_indices = @transform_1, window_bounds = array<i64: 256, 128>}, {pipeline_mode = #tpu.pipeline_mode<synchronous>, transform_indices = @transform_2, window_bounds = array<i64: 256, 128>}, {pipeline_mode = #tpu.pipeline_mode<synchronous>, transform_indices = @transform_3, window_bounds = array<i64: 1, 128>}, {pipeline_mode = #tpu.pipeline_mode<synchronous>, transform_indices = @transform_4, window_bounds = array<i64: 128, 128>}, {pipeline_mode = #tpu.pipeline_mode<synchronous>, transform_indices = @transform_5, window_bounds = array<i64: 128, 128>}, {transform_indices = @transform_6, window_bounds = array<i64: 128, 128>}]} {
    %c128_i32 = arith.constant 128 : i32
    %0 = arith.muli %arg0, %c128_i32 : i32
    %1 = tpu.assume_multiple %0, 128 : i32
    %2 = arith.index_cast %1 : i32 to index
    %c0 = arith.constant 0 : index
    %3 = vector.load %arg2[%2, %c0] : memref<256x128xbf16, #tpu.memory_space<vmem>>, vector<128x128xbf16>
    %c0_0 = arith.constant 0 : index
    %c0_1 = arith.constant 0 : index
    %4 = vector.load %arg1[%c0_0, %c0_1] : memref<128x256xbf16, #tpu.memory_space<vmem>>, vector<128x256xbf16>
    %c0_2 = arith.constant 0 : index
    %c0_3 = arith.constant 0 : index
    %5 = vector.load %arg2[%c0_2, %c0_3] : memref<256x128xbf16, #tpu.memory_space<vmem>>, vector<256x128xbf16>
    %cst = arith.constant dense<0.000000e+00> : vector<128x128xf32>
    %6 = tpu.matmul %4, %5, %cst {dimension_numbers = #tpu.dot_dimension_numbers<[1], [0], [0], [1], [0, 0, 1, 1], [], []>} : vector<128x256xbf16>, vector<256x128xbf16>, vector<128x128xf32> -> vector<128x128xf32>
    %7 = arith.truncf %6 : vector<128x128xf32> to vector<128x128xbf16>
    %8 = tpu.concatenate %3, %7 in 1 : vector<128x128xbf16>, vector<128x128xbf16> -> vector<128x256xbf16>
    %c0_4 = arith.constant 0 : index
    %c0_5 = arith.constant 0 : index
    %9 = vector.load %arg3[%c0_4, %c0_5] : memref<256x128xbf16, #tpu.memory_space<vmem>>, vector<256x128xbf16>
    %cst_6 = arith.constant dense<0.000000e+00> : vector<128x128xf32>
    %10 = tpu.matmul %8, %9, %cst_6 {dimension_numbers = #tpu.dot_dimension_numbers<[1], [0], [0], [1], [0, 0, 1, 1], [], []>} : vector<128x256xbf16>, vector<256x128xbf16>, vector<128x128xf32> -> vector<128x128xf32>
    %c0_7 = arith.constant 0 : index
    %c0_8 = arith.constant 0 : index
    %11 = vector.load %arg4[%c0_7, %c0_8] : memref<1x128xf32, #tpu.memory_space<vmem>>, vector<1x128xf32>
    %12 = vector.broadcast %11 : vector<1x128xf32> to vector<128x128xf32>
    %13 = arith.addf %10, %12 : vector<128x128xf32>
    %14 = arith.truncf %13 : vector<128x128xf32> to vector<128x128xbf16>
    %c0_9 = arith.constant 0 : index
    %c0_10 = arith.constant 0 : index
    %15 = vector.load %arg5[%c0_9, %c0_10] : memref<128x128xbf16, #tpu.memory_space<vmem>>, vector<128x128xbf16>
    %cst_11 = arith.constant dense<0.000000e+00> : vector<128x128xf32>
    %16 = tpu.matmul %14, %15, %cst_11 {dimension_numbers = #tpu.dot_dimension_numbers<[1], [0], [0], [1], [0, 0, 1, 1], [], []>} : vector<128x128xbf16>, vector<128x128xbf16>, vector<128x128xf32> -> vector<128x128xf32>
    %17 = arith.mulf %13, %16 : vector<128x128xf32>
    %18 = arith.mulf %16, %16 : vector<128x128xf32>
    %19 = tpu.concatenate %17, %18 in 0 : vector<128x128xf32>, vector<128x128xf32> -> vector<256x128xf32>
    %20 = arith.truncf %19 : vector<256x128xf32> to vector<256x128xbf16>
    %c0_12 = arith.constant 0 : index
    %c0_13 = arith.constant 0 : index
    %21 = vector.load %arg6[%c0_12, %c0_13] : memref<128x128xbf16, #tpu.memory_space<vmem>>, vector<128x128xbf16>
    %cst_14 = arith.constant dense<0.000000e+00> : vector<256x128xf32>
    %22 = tpu.matmul %20, %21, %cst_14 {dimension_numbers = #tpu.dot_dimension_numbers<[1], [0], [0], [1], [0, 0, 1, 1], [], []>} : vector<256x128xbf16>, vector<128x128xbf16>, vector<256x128xf32> -> vector<256x128xf32>
    %23 = vector.extract_strided_slice %22 {offsets = [0, 0], sizes = [128, 128], strides = [1, 1]} : vector<256x128xf32> to vector<128x128xf32>
    %24 = vector.extract_strided_slice %22 {offsets = [128, 0], sizes = [128, 128], strides = [1, 1]} : vector<256x128xf32> to vector<128x128xf32>
    %cst_15 = arith.constant 9.99999997E-7 : f32
    %25 = vector.broadcast %cst_15 : f32 to vector<128x128xf32>
    %26 = arith.addf %24, %25 : vector<128x128xf32>
    %27 = tpu.reciprocal %26 {approx = true} : vector<128x128xf32> -> vector<128x128xf32>
    %28 = arith.mulf %26, %27 : vector<128x128xf32>
    %cst_16 = arith.constant 2.000000e+00 : f32
    %29 = vector.broadcast %cst_16 : f32 to vector<128x128xf32>
    %30 = arith.subf %29, %28 : vector<128x128xf32>
    %31 = arith.mulf %27, %30 : vector<128x128xf32>
    %32 = arith.mulf %23, %31 : vector<128x128xf32>
    %33 = arith.mulf %32, %16 : vector<128x128xf32>
    %34 = arith.subf %13, %33 : vector<128x128xf32>
    %cst_17 = arith.constant 2.000000e-01 : f32
    %35 = vector.broadcast %cst_17 : f32 to vector<128x128xf32>
    %36 = arith.mulf %35, %13 : vector<128x128xf32>
    %cst_18 = arith.constant 0.000000e+00 : f32
    %37 = vector.broadcast %cst_18 : f32 to vector<128x128xf32>
    %38 = arith.cmpf oge, %23, %37 : vector<128x128xf32>
    %39 = arith.select %38, %13, %34 : vector<128x128xi1>, vector<128x128xf32>
    %cst_19 = arith.constant 8.000000e-01 : f32
    %40 = vector.broadcast %cst_19 : f32 to vector<128x128xf32>
    %41 = arith.mulf %40, %39 : vector<128x128xf32>
    %42 = arith.addf %36, %41 : vector<128x128xf32>
    %43 = arith.extf %3 : vector<128x128xbf16> to vector<128x128xf32>
    %44 = arith.addf %42, %43 : vector<128x128xf32>
    %c0_20 = arith.constant 0 : index
    %c0_21 = arith.constant 0 : index
    %45 = vector.load %arg7[%c0_20, %c0_21] : memref<128x128xf32, #tpu.memory_space<vmem>>, vector<128x128xf32>
    tpu.vector_store %arg7[%c0_20, %c0_21], %44 {strides = array<i32>} : memref<128x128xf32, #tpu.memory_space<vmem>>, vector<128x128xf32>,
    return
  }
  func.func @transform_0(%arg0: i32) -> (i32, i32) {
    %c0_i32 = arith.constant 0 : i32
    %c0_i32_0 = arith.constant 0 : i32
    return %arg0, %c0_i32 : i32, i32
  }
  func.func @transform_1(%arg0: i32) -> (i32, i32) {
    %c0_i32 = arith.constant 0 : i32
    %c0_i32_0 = arith.constant 0 : i32
    %c0_i32_1 = arith.constant 0 : i32
    return %c0_i32, %c0_i32_0 : i32, i32
  }
  func.func @transform_2(%arg0: i32) -> (i32, i32) {
    %c0_i32 = arith.constant 0 : i32
    %c0_i32_0 = arith.constant 0 : i32
    %c0_i32_1 = arith.constant 0 : i32
    return %c0_i32, %c0_i32_0 : i32, i32
  }
  func.func @transform_3(%arg0: i32) -> (i32, i32) {
    %c0_i32 = arith.constant 0 : i32
    %c0_i32_0 = arith.constant 0 : i32
    %c0_i32_1 = arith.constant 0 : i32
    return %c0_i32, %c0_i32_0 : i32, i32
  }
  func.func @transform_4(%arg0: i32) -> (i32, i32) {
    %c0_i32 = arith.constant 0 : i32
    %c0_i32_0 = arith.constant 0 : i32
    %c0_i32_1 = arith.constant 0 : i32
    return %c0_i32, %c0_i32_0 : i32, i32
  }
  func.func @transform_5(%arg0: i32) -> (i32, i32) {
    %c0_i32 = arith.constant 0 : i32
    %c0_i32_0 = arith.constant 0 : i32
    %c0_i32_1 = arith.constant 0 : i32
    return %c0_i32, %c0_i32_0 : i32, i32
  }
  func.func @transform_6(%arg0: i32) -> (i32, i32) {
    %c0_i32 = arith.constant 0 : i32
    %c0_i32_0 = arith.constant 0 : i32
    return %arg0, %c0_i32 : i32, i32
  }
}

</mosaic_0001>

<bundles_post_ra>
// kernel: tpu_custom_call.1
= control target key start
LH: loop header
LB: loop body
LE: loop exit
PB: predicated region body
PF: predicated region fallthrough
CT: control target
= control target key end

     0   :  { %11 = vsyncpa [#allocation3], 0  ;;  %s3338_s0 = inlined_call_operand.hbm [shape: bf16[256,256], index: 0, kind: input, shape index: {}]   ;;  %s3339_s1 = inlined_call_operand.hbm [shape: bf16[256,128], index: 1, kind: input, shape index: {}]   ;;  %s3340_s2 = inlined_call_operand.hbm [shape: bf16[256,128], index: 2, kind: input, shape index: {}]   ;;  %s3341_s3 = inlined_call_operand.vmem [shape: f32[1,128], index: 3, kind: input, shape index: {}]   ;;  %s3342_s4 = inlined_call_operand.hbm [shape: bf16[128,128], index: 4, kind: input, shape index: {}]   ;;  %s3343_s5 = inlined_call_operand.hbm [shape: bf16[128,128], index: 5, kind: input, shape index: {}]   ;;  %s3344_s6 = inlined_call_operand.hbm [shape: f32[256,128], index: 6, kind: output, shape index: {}]  }
   0x1   :  { %13 = vsyncpa [#allocation3 + $0x1], 0 }
   0x2   :  { %14 = vsyncpa [#allocation6], 0 }
   0x3   :  { %15 = vsyncpa [#allocation9], 0 }
   0x4   :  { %16 = vsyncpa [#allocation4], 0 }
   0x5   :  { %18 = vsyncpa [#allocation4 + $0x1], 0  ;;  %s2620_s21 = smov 0   ;;  %s2622_s22 = smov 0  }
   0x6   :  { %s2624_s23 = smov 0   ;;  %s2626_s24 = smov 0  }
   0x7 LB: > { %s2641_s25 = sadd.s32 4294967295, %s2571_s24   ;;  %s1787_s26 = sadd.s32 4294967294, %s2571_s24   ;;  %s2571_s24 = sphi %s2626_s24, %s3466_s24   ;;  %s2567_s23 = sphi %s2624_s23, %s3465_s23   ;;  %s2563_s22 = sphi %s2622_s22, %s3464_s22   ;;  %s2559_s21 = sphi %s2620_s21, %s3463_s21  }
   0x8   : > { %p44_p0 = scmp.ne.s32.totalorder %s2563_s22, %s2559_s21  ;;  %p3345_p1 = scmp.eq.s32.totalorder %s2641_s25, 0 }
   0x9   : > { %p173_p2 = scmp.eq.s32.totalorder %s2641_s25, 1  ;;  %p179_p3 = scmp.eq.s32.totalorder %s1787_s26, 1 }
   0xa   : > { %p2650_p4 = por %p3345_p1, %p44_p0  ;;  %p1788_p5 = scmp.ge.s32.totalorder %s2571_s24, 1 }
   0xb   : > { %p2655_p6 = por %p179_p3, %p44_p0  ;;  %p186_p7 = scmp.lt.s32.totalorder %s2571_s24, 3 }
   0xc   : > { %s3383_s27 = scalar_select %p2650_p4, 1, 0 }
   0xd   : > { %s3384_s28 = scalar_select %p2655_p6, 1, 0 }
   0xe   : > { %p2660_p8 = pnand %p1788_p5, %p186_p7  ;;  %s2573_s30 = smov [#allocation5]  }
   0xf   : > { %s198_s7 = sshll.u32 %s2573_s30, 4  ;;  %s2574_s9 = smov [#allocation8]   ;;  %s199_s7 = int_to_ptr.vmem [resolvable:$true] %s198_s7 }
  0x10   : > { %s3385_s29 = scalar_select %p2660_p8, 1, 0 }
  0x11   : > { %p2172_p9 = pneg %p2660_p8  ;;  %s227_s10 = sshll.u32 %s2574_s9, 4  ;;  %s228_s10 = int_to_ptr.vmem [resolvable:$true] %s227_s10 }
  0x12   : > { %s2575_s11 = smov [#allocation7]   ;;  %s2378_s13 = scalar_lea.vmem %s199_s7, 2048 }
  0x13   : > { %p2669_p11 = pnand %p2172_p9, %p3345_p1  ;;  %s211_s12 = sshll.u32 %s2575_s11, 4  ;;  %s212_s12 = int_to_ptr.vmem [resolvable:$true] %s211_s12 }
  0x14   : > { %p2379_p13 = scmp.ne.s32.totalorder %s199_s7, %s2378_s13  ;;  %p2386_p5 = scmp.lt.s32.totalorder %s199_s7, %s199_s7 }
  0x15   : > { %p2369_p12 = pneg %p2669_p11  ;;  %p2387_p7 = scmp.lt.s32.totalorder %s2378_s13, %s2378_s13 }
  0x17   : > { %p2381_p0 = pnand %p2379_p13, %p2369_p12  ;;  %p2388_p9 = por %p2387_p7, %p2386_p5 }
  0x19   : > { %p2382_p3 = pneg %p2381_p0 }
  0x1b   : > { %p2389_p10 = pnand %p2388_p9, %p2382_p3 }
  0x1d   : > { %2392 = shalt.err (!%p2389_p10)
}
  0x1e   : > { %s2576_s14 = smov 64   ;;  %s2577_s15 = smov 4  }
  0x1f   : > { %2175 = dma.hbm_to_vmem [thread:$0]  (!%p2669_p11), %s3339_s1, 2048, %s199_s7, [#allocation6], %s2576_s14, %s2576_s14, %s2577_s15  }
  0x20   : > { %s2404_s18 = scalar_lea.vmem %s228_s10, 1024  ;;  %p2412_p3 = scmp.lt.s32.totalorder %s228_s10, %s228_s10 }
  0x21   : > { %p2405_p13 = scmp.ne.s32.totalorder %s228_s10, %s2404_s18  ;;  %p2413_p10 = scmp.lt.s32.totalorder %s2404_s18, %s2404_s18 }
  0x23   : > { %p2407_p0 = pnand %p2405_p13, %p2369_p12  ;;  %p2414_p7 = por %p2413_p10, %p2412_p3 }
  0x25   : > { %p2408_p5 = pneg %p2407_p0 }
  0x27   : > { %p2415_p9 = pnand %p2414_p7, %p2408_p5 }
  0x29   : > { %2418 = shalt.err (!%p2415_p9)
}
  0x2a   : > { %2181 = dma.hbm_to_vmem [thread:$0]  (!%p2669_p11), %s3342_s4, 1024, %s228_s10, [#allocation9], %s2576_s14, %s2576_s14, %s2577_s15  }
  0x2b   : > { %s2430_s26 = scalar_lea.vmem %s212_s12, 2048  ;;  %p2438_p3 = scmp.lt.s32.totalorder %s212_s12, %s212_s12 }
  0x2c   : > { %p2431_p1 = scmp.ne.s32.totalorder %s212_s12, %s2430_s26  ;;  %p2439_p5 = scmp.lt.s32.totalorder %s2430_s26, %s2430_s26 }
  0x2e   : > { %p2433_p13 = pnand %p2431_p1, %p2369_p12  ;;  %p2440_p10 = por %p2439_p5, %p2438_p3 }
  0x30   : > { %p2434_p0 = pneg %p2433_p13 }
  0x32   : > { %p2441_p7 = pnand %p2440_p10, %p2434_p0 }
  0x34   : > { %2444 = shalt.err (!%p2441_p7)
}
  0x35   : > { %2178 = dma.hbm_to_vmem [thread:$0]  (!%p2669_p11), %s3340_s2, 2048, %s212_s12, [#allocation6], %s2576_s14, %s2576_s14, %s2577_s15  }
  0x36   : > { %s2578_s9 = smov [#allocation10]  }
  0x37   : > { %s240_s10 = sshll.u32 %s2578_s9, 4  ;;  %s241_s10 = int_to_ptr.vmem [resolvable:$true] %s240_s10 }
  0x38   : > { %s2456_s11 = scalar_lea.vmem %s241_s10, 1024  ;;  %p2464_p0 = scmp.lt.s32.totalorder %s241_s10, %s241_s10 }
  0x39   : > { %p2457_p1 = scmp.ne.s32.totalorder %s241_s10, %s2456_s11  ;;  %p2465_p3 = scmp.lt.s32.totalorder %s2456_s11, %s2456_s11 }
  0x3b   : > { %p2459_p9 = pnand %p2457_p1, %p2369_p12  ;;  %p2466_p5 = por %p2465_p3, %p2464_p0 }
  0x3d   : > { %p2460_p13 = pneg %p2459_p9 }
  0x3f   : > { %p2467_p10 = pnand %p2466_p5, %p2460_p13 }
  0x41   : > { %2470 = shalt.err (!%p2467_p10)
}
  0x42   : > { %2184 = dma.hbm_to_vmem [thread:$0]  (!%p2669_p11), %s3343_s5, 1024, %s241_s10, [#allocation9], %s2576_s14, %s2576_s14, %s2577_s15  }
  0x43   : > { %s2720_s16 = sadd.s32 1, %s2571_s24   ;;  %s31_s8 = sadd.s32 1, %s2567_s23 }
  0x44   : > { %s28_s17 = ssub.s32 %s2571_s24, %s2720_s16  ;;  %p38_p12 = scmp.ne.s32.totalorder %s2567_s23, %s2563_s22 }
  0x45   : > { %p29_p7 = scmp.eq.s32.totalorder %s28_s17, 0  ;;  %p39_p1 = scmp.eq.s32.totalorder %s2571_s24, 0 }
  0x46   : > { %p2730_p9 = por %p173_p2, %p38_p12  ;;  %p2197_p13 = scmp.lt.s32.totalorder %s2571_s24, 2 }
  0x47   : > { %s2736_s19 = scalar_select %p29_p7, %s2567_s23, %s31_s8  }
  0x48   : > { %s3387_s18 = scalar_select %p2730_p9, 1, 0 }
  0x49   : > { %p40_p0 = por %p39_p1, %p38_p12  ;;  %s254_s20 = sand.u32 1, %s2567_s23  }
  0x4a   : > { %s1794_s26 = sshll.u32 %s254_s20, 7  ;;  %s1886_s14 = sshll.u32 %s2571_s24, 11 }
  0x4b   : > { %s2743_s7 = scalar_lea.hbm %s3338_s0, %s1886_s14  ;;  %s258_s9 = scalar_lea.vmem [#allocation2], %s1794_s26 }
  0x4c   : > { %s266_s10 = sshll.u32 %s258_s9, 4  ;;  %p2747_p2 = pnand %p2197_p13, %p40_p0  ;;  %s2745_s10 = int_to_ptr.vmem [resolvable:$true] %s266_s10 }
  0x4d   : > { %s2751_s12 = scalar_lea.sflag [#allocation3], %s254_s20  ;;  %s2471_s13 = scalar_lea.hbm %s2743_s7, 2048 }
  0x4e   : > { %p2472_p11 = scmp.ne.s32.totalorder %s2743_s7, %s2471_s13  ;;  %p2473_p3 = pneg %p2747_p2 }
  0x4f   : > { %s2476_s26 = scalar_lea.hbm %s3338_s0, 4096  ;;  %p2477_p12 = scmp.lt.s32.totalorder %s2743_s7, %s3338_s0 }
  0x50   : > { %p2474_p5 = pnand %p2473_p3, %p2472_p11  ;;  %p2478_p7 = scmp.lt.s32.totalorder %s2476_s26, %s2471_s13 }
  0x52   : > { %p2475_p10 = pneg %p2474_p5  ;;  %p2479_p1 = por %p2478_p7, %p2477_p12 }
  0x54   : > { %p2480_p13 = pnand %p2479_p1, %p2475_p10 }
  0x56   : > { %2483 = shalt.err (!%p2480_p13)
}
  0x57   : > { %s2484_s20 = scalar_lea.vmem %s2745_s10, 2048  ;;  %s2579_s30 = smov [#allocation2]  }
  0x58   : > { %p2485_p0 = scmp.ne.s32.totalorder %s2745_s10, %s2484_s20  ;;  %s2489_s9 = sshll.u32 %s2579_s30, 4  ;;  %s2490_s9 = int_to_ptr.vmem [resolvable:$false] %s2489_s9 }
  0x59   : > { %s2491_s8 = scalar_lea.vmem %s2490_s9, 4096  ;;  %p2492_p5 = scmp.lt.s32.totalorder %s2745_s10, %s2490_s9 }
  0x5a   : > { %p2487_p6 = pnand %p2485_p0, %p2473_p3  ;;  %p2493_p9 = scmp.lt.s32.totalorder %s2491_s8, %s2484_s20 }
  0x5c   : > { %p2488_p11 = pneg %p2487_p6  ;;  %p2494_p4 = por %p2493_p9, %p2492_p5 }
  0x5e   : > { %p2495_p8 = pnand %p2494_p4, %p2488_p11 }
  0x60   : > { %2498 = shalt.err (!%p2495_p8)
}
  0x61   : > { %s2580_s13 = smov 128   ;;  %s2581_s17 = smov 8  }
  0x62   : > { %2188 = dma.hbm_to_vmem [thread:$0]  (!%p2747_p2), %s2743_s7, 2048, %s2745_s10, %s2751_s12, %s2580_s13, %s2580_s13, %s2581_s17  }
  0x63   : > { %p3389_p3 = scmp.ne.s32.totalorder %s3385_s29, 0 }
  0x65   : > { %278 = sbr.rel (%p3389_p3) target bundleno = 1120 (0x460), region = 44 }
  0x6a   : > { %s2775_s26 = sand.u32 1, %s2563_s22   ;;  %p3390_p4 = scmp.ne.s32.totalorder %s3383_s27, 0 }
  0x6b   : > { %s1799_s14 = sshll.u32 %s2775_s26, 7  ;;  %s281_s15 = scalar_lea.sflag [#allocation3], %s2775_s26 }
  0x6c   : > { %s2781_s20 = scalar_lea.vmem [#allocation2], %s1799_s14 }
  0x6d   : > { %2542 = dma.done.wait (%p3390_p4), %s281_s15, 2048  }
  0x6e   : > { %2544 = vsyncadd (%p3390_p4), %s281_s15, 4294965248  ;;  %p3391_p6 = scmp.eq.s32.totalorder %s2641_s25, 0 }
  0x70   : > { %2546 = dma.done.wait (%p3391_p6), [#allocation6], 4096   ;;  %p3392_p8 = pmov %p3391_p6 }
  0x71   : > { %p3393_p9 = pmov %p3391_p6 }
  0x72   : > { %2548 = vsyncadd (%p3392_p8), [#allocation6], 4294963200 }
  0x73   : > { %2550 = dma.done.wait (%p3393_p9), [#allocation9], 2048   ;;  %p3394_p2 = pmov %p3391_p6 }
  0x74   : > { %v2245_v0 = vld [vmem:[#allocation5 + $0x78] sm:$0xff]   ;;  %v2247_v2 = vld [vmem:[#allocation5 + $0x70] sm:$0xff]   ;;  %v2249_v4 = vld [vmem:[#allocation5 + $0x68] sm:$0xff]   ;;  %s1805_s27 = sshll.u32 %s2641_s25, 7  ;;  %s3162_s30 = scalar_lea.vmem [#allocation11], %s1799_s14 }
  0x75   : > { %2552 = vsyncadd (%p3394_p2), [#allocation9], 4294965248  ;;  %v2246_v1 = vld [vmem:[#allocation5 + $0x38] sm:$0xff]   ;;  %1888 = vmatprep.subr.bf16.mxu0 %v2245_v0  ;;  %v2248_v3 = vld [vmem:[#allocation5 + $0x30] sm:$0xff]   ;;  %s333_s29 = sshra.s32 %s1805_s27, 3  ;;  %s1887_s9 = sshll.u32 %s2641_s25, 11 }
  0x76   : > { %1889 = vmatpush3.bf16.msra.mxu0 %v2246_v1  ;;  %v2250_v5 = vld [vmem:[#allocation5 + $0x28] sm:$0xff]   ;;  %v2251_v6 = vld [vmem:[#allocation5 + $0x60] sm:$0xff]   ;;  %v2253_v8 = vld [vmem:[#allocation5 + $0x58] sm:$0xff]   ;;  %s1806_s7 = sshll.u32 %s333_s29, 2  ;;  %s1674_s8 = sshll.u32 %s3162_s30, 4  ;;  %s3293_s8 = int_to_ptr.vmem [resolvable:$true] %s1674_s8 }
  0x77   : > { %1890 = vmatprep.subr.bf16.mxu0 %v2247_v2  ;;  %v2252_v7 = vld [vmem:[#allocation5 + $0x20] sm:$0xff]   ;;  %v2254_v9 = vld [vmem:[#allocation5 + $0x18] sm:$0xff]   ;;  %v2255_v10 = vld [vmem:[#allocation5 + $0x50] sm:$0xff]   ;;  %s2812_s10 = scalar_lea.vmem [#allocation5], %s1806_s7  ;;  %s3291_s14 = scalar_lea.hbm %s3344_s6, %s1887_s9 }
  0x78   : > { %v2263_v11 = vld [vmem:[%s2781_s20 + $0x4] ss:$8 sps:$4 sm:$0xff]   ;;  %v2256_v12 = vld [vmem:[#allocation5 + $0x10] sm:$0xff]   ;;  %v2285_v17 = vld [vmem:[#allocation7 + $0x78] sm:$0xff]   ;;  %s1661_s15 = scalar_lea.sflag [#allocation4], %s2775_s26  ;;  %s2499_s25 = scalar_lea.vmem %s3293_s8, 2048 }
  0x79   : > { %609 = vmatprep.mubr.bf16.mxu0 %v2263_v11  ;;  %v2257_v13 = vld [vmem:[#allocation5 + $0x48] sm:$0xff]   ;;  %v2259_v15 = vld [vmem:[#allocation5 + $0x40] sm:$0xff]   ;;  %v2286_v19 = vld [vmem:[#allocation7 + $0x38] sm:$0xff]   ;;  %1952 = vmatprep.subr.bf16.mxu1 %v2285_v17  ;;  %p2500_p10 = scmp.ne.s32.totalorder %s3293_s8, %s2499_s25  ;;  %p3460_p12 = scmp.ne.s32.totalorder %s3387_s18, 0 }
  0x7a   : > { %1891 = vmatpush3.bf16.msra.mxu0 %v2248_v3  ;;  %v2258_v14 = vld [vmem:[#allocation5 + $0x8] sm:$0xff]   ;;  %v2260_v16 = vld [vmem:[#allocation5] sm:$0xff]   ;;  %v2264_v20 = vld [vmem:[%s2781_s20 + $0x14] ss:$8 sps:$4 sm:$0xff]   ;;  %1953 = vmatpush3.bf16.msra.mxu1 %v2286_v19 }
  0x7b   : > { %1892 = vmatprep.subr.bf16.mxu0 %v2249_v4  ;;  %v2261_v18 = vld [vmem:[%s2781_s20] ss:$8 sps:$4 sm:$0xff]   ;;  %v2287_v21 = vld [vmem:[#allocation7 + $0x70] sm:$0xff]   ;;  %v2267_v28 = vld [vmem:[%s2781_s20 + $0x24] ss:$8 sps:$4 sm:$0xff]   ;;  %p2501_p7 = pnand %p2500_p10, %p3460_p12 }
  0x7c   : > { %v2288_v22 = vld [vmem:[#allocation7 + $0x30] sm:$0xff]   ;;  %1954 = vmatprep.subr.bf16.mxu1 %v2287_v21  ;;  %v2289_v23 = vld [vmem:[#allocation7 + $0x68] sm:$0xff]   ;;  %v2291_v25 = vld [vmem:[#allocation7 + $0x60] sm:$0xff]  }
  0x7d   : > { %v2290_v24 = vld [vmem:[#allocation7 + $0x28] sm:$0xff]   ;;  %v2266_v26 = vld [vmem:[%s2781_s20 + $0x10] ss:$8 sps:$4 sm:$0xff]   ;;  %v2292_v27 = vld [vmem:[#allocation7 + $0x20] sm:$0xff]   ;;  %p2502_p1 = pneg %p2501_p7 }
  0x7e   : > { %1893 = vmatpush3.bf16.msra.mxu0 %v2250_v5  ;;  %1955 = vmatpush3.bf16.msra.mxu1 %v2288_v22  ;;  %v2293_v29 = vld [vmem:[#allocation7 + $0x58] sm:$0xff]   ;;  %v2269_v31 = vld [vmem:[%s2781_s20 + $0x20] ss:$8 sps:$4 sm:$0xff]   ;;  %v2273_v34 = vld [vmem:[%s2781_s20 + $0x44] ss:$8 sps:$4 sm:$0xff]  }
  0x7f   : > { %1894 = vmatprep.subr.bf16.mxu0 %v2251_v6  ;;  %1956 = vmatprep.subr.bf16.mxu1 %v2289_v23  ;;  %v2294_v30 = vld [vmem:[#allocation7 + $0x18] sm:$0xff]   ;;  %v2275_v35 = vld [vmem:[%s2781_s20 + $0x40] ss:$8 sps:$4 sm:$0xff]   ;;  %v2279_v38 = vld [vmem:[%s2781_s20 + $0x64] ss:$8 sps:$4 sm:$0xff]  }
  0x80   : > { %v2270_v32 = vld [vmem:[%s2781_s20 + $0x34] ss:$8 sps:$4 sm:$0xff]   ;;  %v2272_v33 = vld [vmem:[%s2781_s20 + $0x30] ss:$8 sps:$4 sm:$0xff]   ;;  %v2281_v39 = vld [vmem:[%s2781_s20 + $0x60] ss:$8 sps:$4 sm:$0xff]  }
  0x81   : > { %v2276_v36 = vld [vmem:[%s2781_s20 + $0x54] ss:$8 sps:$4 sm:$0xff]   ;;  %v2278_v37 = vld [vmem:[%s2781_s20 + $0x50] ss:$8 sps:$4 sm:$0xff]   ;;  %v2297_v44 = vld [vmem:[#allocation7 + $0x48] sm:$0xff]  }
  0x82   : > { %1895 = vmatpush3.bf16.msra.mxu0 %v2252_v7  ;;  %1957 = vmatpush3.bf16.msra.mxu1 %v2290_v24  ;;  %v2282_v40 = vld [vmem:[%s2781_s20 + $0x74] ss:$8 sps:$4 sm:$0xff]   ;;  %v2284_v41 = vld [vmem:[%s2781_s20 + $0x70] ss:$8 sps:$4 sm:$0xff]   ;;  %v2298_v45 = vld [vmem:[#allocation7 + $0x8] sm:$0xff]   ;;  %s2582_s20 = smov [#allocation11]  }
  0x83   : > { %1896 = vmatprep.subr.bf16.mxu0 %v2253_v8  ;;  %1958 = vmatprep.subr.bf16.mxu1 %v2291_v25  ;;  %v2295_v42 = vld [vmem:[#allocation7 + $0x50] sm:$0xff]   ;;  %v2299_v46 = vld [vmem:[#allocation7 + $0x40] sm:$0xff]   ;;  %v2309_v48 = vld [vmem:[#allocation8 + $0x38] sm:$0xff]   ;;  %s2503_s27 = sshll.u32 %s2582_s20, 4  ;;  %s2504_s27 = int_to_ptr.vmem [resolvable:$false] %s2503_s27 }
  0x84   : > { %v2296_v43 = vld [vmem:[#allocation7 + $0x10] sm:$0xff]   ;;  %v2300_v47 = vld [vmem:[#allocation7] sm:$0xff]   ;;  %v2311_v50 = vld [vmem:[#allocation8 + $0x28] sm:$0xff]   ;;  %s2505_s29 = scalar_lea.vmem %s2504_s27, 4096  ;;  %p2506_p13 = scmp.lt.s32.totalorder %s3293_s8, %s2504_s27 }
  0x85   : > { %v2310_v49 = vld [vmem:[#allocation8 + $0x30] sm:$0xff]   ;;  %v2815_v54 = vld [vmem:[%s2812_s10] sm:$0xff]   ;;  %v2819_v62 = vld [vmem:[%s2812_s10 + $0x8] sm:$0xff]   ;;  %p2507_p0 = scmp.lt.s32.totalorder %s2505_s29, %s2499_s25 }
  0x86   : > { %1897 = vmatpush3.bf16.msra.mxu0 %v2254_v9  ;;  %1959 = vmatpush3.bf16.msra.mxu1 %v2292_v27  ;;  %v2823_v6 = vld [vmem:[%s2812_s10 + $0x10] sm:$0xff]   ;;  %v2831_v22 = vld [vmem:[%s2812_s10 + $0x20] sm:$0xff]  }
  0x87   : > { %1898 = vmatprep.subr.bf16.mxu0 %v2255_v10  ;;  %1960 = vmatprep.subr.bf16.mxu1 %v2293_v29  ;;  %3395 = vst [vmem:[#allocation16_spill] sm:$0xff] %v2831_v22  ;;  %p2508_p11 = por %p2507_p0, %p2506_p13 }
  0x89   : > { %p2509_p5 = pnand %p2508_p11, %p2502_p1 }
  0x8a   : > { %1899 = vmatpush3.bf16.msra.mxu0 %v2256_v12  ;;  %1961 = vmatpush3.bf16.msra.mxu1 %v2294_v30  ;;  %v2835_v30 = vld [vmem:[%s2812_s10 + $0x28] sm:$0xff]  }
  0x8b   : > { %1900 = vmatprep.subr.bf16.mxu0 %v2257_v13  ;;  %1962 = vmatprep.subr.bf16.mxu1 %v2295_v42  ;;  %3396 = vst [vmem:[#allocation17_spill] sm:$0xff] %v2835_v30 }
  0x8e   : > { %1901 = vmatpush3.bf16.msra.mxu0 %v2258_v14  ;;  %1963 = vmatpush3.bf16.msra.mxu1 %v2296_v43  ;;  %v2827_v14 = vld [vmem:[%s2812_s10 + $0x18] sm:$0xff]  }
  0x8f   : > { %1902 = vmatprep.subr.bf16.mxu0 %v2259_v15  ;;  %1964 = vmatprep.subr.bf16.mxu1 %v2297_v44 }
  0x92   : > { %1903 = vmatpush3.bf16.msra.mxu0 %v2260_v16  ;;  %1965 = vmatpush3.bf16.msra.mxu1 %v2298_v45 }
  0x93   : > { %1966 = vmatprep.subr.bf16.mxu1 %v2299_v46  ;;  %2056 = vmatprep.subr.bf16.mxu0 %v2309_v48  ;;  %v2840_v46 = vld [vmem:[%s2812_s10 + $0x38] sm:$0xff]  }
  0x94   : > { %3397 = vst [vmem:[#allocation18_spill] sm:$0xff] %v2840_v46 }
  0x95   : > { %610 = vmatmul.mubr.bf16.vlgmr.msra.gmra.mxu0 %v2261_v18 }
  0x96   : > { %617 = vmatprep.mubr.bf16.mxu0 %v2264_v20  ;;  %1967 = vmatpush3.bf16.msra.mxu1 %v2300_v47 }
  0x97   : > { %2057 = vmatpush3.bf16.msra.mxu0 %v2309_v48 }
  0x98   : > { %2058 = vmatprep.subr.bf16.mxu0 %v2310_v49 }
  0x9b   : > { %2059 = vmatpush3.bf16.msra.mxu0 %v2310_v49 }
  0x9c   : > { %2060 = vmatprep.subr.bf16.mxu0 %v2311_v50 }
  0x9d   : > { %618 = vmatmul.mubr.bf16.gmra.mxu0 %v2266_v26 }
  0x9e   : > { %625 = vmatprep.mubr.bf16.mxu0 %v2267_v28 }
  0x9f   : > { %2061 = vmatpush3.bf16.msra.mxu0 %v2311_v50 }
  0xa5   : > { %626 = vmatmul.mubr.bf16.gmra.mxu0 %v2269_v31 }
  0xa6   : > { %633 = vmatprep.mubr.bf16.mxu0 %v2270_v32 }
  0xad   : > { %634 = vmatmul.mubr.bf16.gmra.mxu0 %v2272_v33 }
  0xae   : > { %641 = vmatprep.mubr.bf16.mxu0 %v2273_v34 }
  0xb5   : > { %642 = vmatmul.mubr.bf16.gmra.mxu0 %v2275_v35 }
  0xb6   : > { %649 = vmatprep.mubr.bf16.mxu0 %v2276_v36 }
  0xbd   : > { %650 = vmatmul.mubr.bf16.gmra.mxu0 %v2278_v37 }
  0xbe   : > { %657 = vmatprep.mubr.bf16.mxu0 %v2279_v38  ;;  %v349_v38 = vld [vmem:[%s2812_s10 + $0x30] sm:$0xff]  }
  0xc5   : > { %658 = vmatmul.mubr.bf16.gmra.mxu0 %v2281_v39 }
  0xc6   : > { %665 = vmatprep.mubr.bf16.mxu0 %v2282_v40 }
  0xcd   : > { %666 = vmatmul.mubr.bf16.gmra.mxu0 %v2284_v41 }
 0x155   : > { %v1904_v51 = vpop.f32.mrf.mxu0 }
 0x157   : > { %v1905_v52 = vpop.f32.mrf.mxu0 }
 0x158   : > { %v1906_v56 = vadd.f32 %v1905_v52, %v1904_v51  ;;  %v2312_v51 = vld [vmem:[#allocation8 + $0x20] sm:$0xff]   ;;  %v2313_v52 = vld [vmem:[#allocation8 + $0x18] sm:$0xff]  }
 0x159   : > { %v1907_v53 = vpop.f32.mrf.mxu0  ;;  %2062 = vmatprep.subr.bf16.mxu0 %v2312_v51 }
 0x15a   : > { %2063 = vmatpush3.bf16.msra.mxu0 %v2312_v51 }
 0x15b   : > { %v1908_v55 = vpop.f32.mrf.mxu0  ;;  %2064 = vmatprep.subr.bf16.mxu0 %v2313_v52 }
 0x15c   : > { %v1909_v57 = vadd.f32 %v1908_v55, %v1907_v53  ;;  %v2314_v53 = vld [vmem:[#allocation8 + $0x10] sm:$0xff]   ;;  %v2315_v55 = vld [vmem:[#allocation8 + $0x8] sm:$0xff]  }
 0x15d   : > { %v1910_v58 = vpop.f32.mrf.mxu0 }
 0x15e   : > { %v674_v59 = vpack.c.bf16 %v1909_v57, %v1906_v56  ;;  %2065 = vmatpush3.bf16.msra.mxu0 %v2313_v52  ;;  %v2316_v56 = vld [vmem:[#allocation8] sm:$0xff]   ;;  %v2317_v57 = vld [vmem:[#allocation10 + $0x38] sm:$0xff]  }
 0x15f   : > { %v1911_v60 = vpop.f32.mrf.mxu0  ;;  %2066 = vmatprep.subr.bf16.mxu0 %v2314_v53  ;;  %2136 = vmatprep.subr.bf16.mxu1 %v2317_v57 }
 0x160   : > { %897 = vmatprep.mubr.bf16.mxu1 %v674_v59  ;;  %v1912_v0 = vadd.f32 %v1911_v60, %v1910_v58  ;;  %v2318_v58 = vld [vmem:[#allocation10 + $0x30] sm:$0xff]   ;;  %v2319_v59 = vld [vmem:[#allocation10 + $0x28] sm:$0xff]   ;;  %v2320_v60 = vld [vmem:[#allocation10 + $0x20] sm:$0xff]  }
 0x161   : > { %v1913_v61 = vpop.f32.mrf.mxu0  ;;  %898 = vmatmul.mubr.bf16.vlgmr.msra.gmra.mxu1 %v2815_v54 }
 0x162   : > { %2067 = vmatpush3.bf16.msra.mxu0 %v2314_v53  ;;  %2144 = vmatpush3.bf16.msra.mxu1 %v2317_v57 }
 0x163   : > { %v1914_v63 = vpop.f32.mrf.mxu0  ;;  %2068 = vmatprep.subr.bf16.mxu0 %v2315_v55  ;;  %2137 = vmatprep.subr.bf16.mxu1 %v2318_v58 }
 0x164   : > { %v1915_v1 = vadd.f32 %v1914_v63, %v1913_v61  ;;  %v2321_v61 = vld [vmem:[#allocation10 + $0x18] sm:$0xff]  }
 0x165   : > { %v1916_v2 = vpop.f32.mrf.mxu0 }
 0x166   : > { %v675_v3 = vpack.c.bf16 %v1915_v1, %v1912_v0  ;;  %2069 = vmatpush3.bf16.msra.mxu0 %v2315_v55  ;;  %2145 = vmatpush3.bf16.msra.mxu1 %v2318_v58 }
 0x167   : > { %v1917_v4 = vpop.f32.mrf.mxu0  ;;  %2070 = vmatprep.subr.bf16.mxu0 %v2316_v56  ;;  %2138 = vmatprep.subr.bf16.mxu1 %v2319_v59 }
 0x168   : > { %905 = vmatprep.mubr.bf16.mxu1 %v675_v3  ;;  %v1918_v8 = vadd.f32 %v1917_v4, %v1916_v2  ;;  %v2846_v3 = vld [vmem:[%s3341_s3] ss:$0 sm:$0xff] }
 0x169   : > { %v1919_v5 = vpop.f32.mrf.mxu0  ;;  %906 = vmatmul.mubr.bf16.gmra.mxu1 %v2819_v62 }
 0x16a   : > { %2071 = vmatpush3.bf16.msra.mxu0 %v2316_v56  ;;  %2146 = vmatpush3.bf16.msra.mxu1 %v2319_v59 }
 0x16b   : > { %v1920_v7 = vpop.f32.mrf.mxu0  ;;  %2088 = vmatprep.subr.bf16.mxu0 %v2317_v57  ;;  %2139 = vmatprep.subr.bf16.mxu1 %v2320_v60 }
 0x16c   : > { %v1921_v9 = vadd.f32 %v1920_v7, %v1919_v5 }
 0x16d   : > { %v1922_v10 = vpop.f32.mrf.mxu0 }
 0x16e   : > { %v676_v11 = vpack.c.bf16 %v1921_v9, %v1918_v8  ;;  %2147 = vmatpush3.bf16.msra.mxu1 %v2320_v60 }
 0x16f   : > { %v1923_v12 = vpop.f32.mrf.mxu0  ;;  %2140 = vmatprep.subr.bf16.mxu1 %v2321_v61 }
 0x170   : > { %913 = vmatprep.mubr.bf16.mxu1 %v676_v11  ;;  %v1924_v16 = vadd.f32 %v1923_v12, %v1922_v10 }
 0x171   : > { %v1925_v13 = vpop.f32.mrf.mxu0  ;;  %914 = vmatmul.mubr.bf16.gmra.mxu1 %v2823_v6 }
 0x172   : > { %2148 = vmatpush3.bf16.msra.mxu1 %v2321_v61 }
 0x173   : > { %v1926_v15 = vpop.f32.mrf.mxu0 }
 0x174   : > { %v1927_v17 = vadd.f32 %v1926_v15, %v1925_v13 }
 0x175   : > { %v1928_v18 = vpop.f32.mrf.mxu0 }
 0x176   : > { %v677_v19 = vpack.c.bf16 %v1927_v17, %v1924_v16 }
 0x177   : > { %v1929_v20 = vpop.f32.mrf.mxu0 }
 0x178   : > { %921 = vmatprep.mubr.bf16.mxu1 %v677_v19  ;;  %v1930_v24 = vadd.f32 %v1929_v20, %v1928_v18 }
 0x179   : > { %v1931_v21 = vpop.f32.mrf.mxu0  ;;  %922 = vmatmul.mubr.bf16.gmra.mxu1 %v2827_v14 }
 0x17b   : > { %v1932_v23 = vpop.f32.mrf.mxu0 }
 0x17c   : > { %v1933_v25 = vadd.f32 %v1932_v23, %v1931_v21 }
 0x17d   : > { %v1934_v26 = vpop.f32.mrf.mxu0 }
 0x17e   : > { %v678_v27 = vpack.c.bf16 %v1933_v25, %v1930_v24 }
 0x17f   : > { %v1935_v28 = vpop.f32.mrf.mxu0 }
 0x180   : > { %929 = vmatprep.mubr.bf16.mxu1 %v678_v27  ;;  %v1936_v32 = vadd.f32 %v1935_v28, %v1934_v26 }
 0x181   : > { %v1937_v29 = vpop.f32.mrf.mxu0  ;;  %930 = vmatmul.mubr.bf16.gmra.mxu1 %v2831_v22 }
 0x183   : > { %v1938_v31 = vpop.f32.mrf.mxu0 }
 0x184   : > { %v1939_v33 = vadd.f32 %v1938_v31, %v1937_v29 }
 0x185   : > { %v1940_v34 = vpop.f32.mrf.mxu0 }
 0x186   : > { %v679_v35 = vpack.c.bf16 %v1939_v33, %v1936_v32 }
 0x187   : > { %v1941_v36 = vpop.f32.mrf.mxu0 }
 0x188   : > { %937 = vmatprep.mubr.bf16.mxu1 %v679_v35  ;;  %v1942_v40 = vadd.f32 %v1941_v36, %v1940_v34 }
 0x189   : > { %v1943_v37 = vpop.f32.mrf.mxu0  ;;  %938 = vmatmul.mubr.bf16.gmra.mxu1 %v2835_v30 }
 0x18b   : > { %v1944_v39 = vpop.f32.mrf.mxu0 }
 0x18c   : > { %v1945_v41 = vadd.f32 %v1944_v39, %v1943_v37 }
 0x18d   : > { %v1946_v42 = vpop.f32.mrf.mxu0 }
 0x18e   : > { %v680_v43 = vpack.c.bf16 %v1945_v41, %v1942_v40 }
 0x18f   : > { %v1947_v44 = vpop.f32.mrf.mxu0 }
 0x190   : > { %945 = vmatprep.mubr.bf16.mxu1 %v680_v43  ;;  %v1948_v48 = vadd.f32 %v1947_v44, %v1946_v42 }
 0x191   : > { %v1949_v45 = vpop.f32.mrf.mxu0  ;;  %946 = vmatmul.mubr.bf16.gmra.mxu1 %v349_v38 }
 0x193   : > { %v1950_v47 = vpop.f32.mrf.mxu0 }
 0x194   : > { %v1951_v49 = vadd.f32 %v1950_v47, %v1949_v45 }
 0x196   : > { %v681_v50 = vpack.c.bf16 %v1951_v49, %v1948_v48 }
 0x198   : > { %953 = vmatprep.mubr.bf16.mxu1 %v681_v50 }
 0x199   : > { %954 = vmatmul.mubr.bf16.gmra.mxu1 %v2840_v46 }
 0x221   : > { %v1968_v63 = vpop.f32.mrf.mxu1 }
 0x223   : > { %v1969_v0 = vpop.f32.mrf.mxu1 }
 0x224   : > { %v1970_v2 = vadd.f32 %v1969_v0, %v1968_v63 }
 0x225   : > { %v1971_v1 = vpop.f32.mrf.mxu1 }
 0x226   : > { %v2849_v8 = vadd.f32 %v1970_v2, %v2846_v3 }
 0x227   : > { %v1972_v4 = vpop.f32.mrf.mxu1 }
 0x228   : > { %v1973_v5 = vadd.f32 %v1972_v4, %v1971_v1 }
 0x229   : > { %v1974_v7 = vpop.f32.mrf.mxu1 }
 0x22a   : > { %v2852_v9 = vadd.f32 %v1973_v5, %v2846_v3 }
 0x22b   : > { %v1975_v10 = vpop.f32.mrf.mxu1 }
 0x22c   : > { %v962_v11 = vpack.c.bf16 %v2852_v9, %v2849_v8  ;;  %v1976_v13 = vadd.f32 %v1975_v10, %v1974_v7 }
 0x22d   : > { %v1977_v12 = vpop.f32.mrf.mxu1 }
 0x22e   : > { %2072 = vmatprep.mubr.bf16.mxu0 %v962_v11  ;;  %v2857_v18 = vadd.f32 %v1976_v13, %v2846_v3 }
 0x22f   : > { %v1978_v15 = vpop.f32.mrf.mxu1 }
 0x230   : > { %v1979_v16 = vadd.f32 %v1978_v15, %v1977_v12 }
 0x231   : > { %v1980_v17 = vpop.f32.mrf.mxu1 }
 0x232   : > { %v2860_v19 = vadd.f32 %v1979_v16, %v2846_v3 }
 0x233   : > { %v1981_v20 = vpop.f32.mrf.mxu1 }
 0x234   : > { %v963_v21 = vpack.c.bf16 %v2860_v19, %v2857_v18  ;;  %v1982_v24 = vadd.f32 %v1981_v20, %v1980_v17 }
 0x235   : > { %v1983_v23 = vpop.f32.mrf.mxu1 }
 0x236   : > { %2073 = vmatmul.mubr.bf16.vlgmr.msra.gmra.mxu0 %v963_v21  ;;  %v2865_v28 = vadd.f32 %v1982_v24, %v2846_v3  ;;  %v2323_v24 = vld [vmem:[#allocation10 + $0x8] sm:$0xff]  }
 0x237   : > { %v1984_v25 = vpop.f32.mrf.mxu1  ;;  %2089 = vmatpush3.bf16.msra.mxu0 %v2317_v57 }
 0x238   : > { %v1985_v26 = vadd.f32 %v1984_v25, %v1983_v23  ;;  %2090 = vmatprep.subr.bf16.mxu0 %v2318_v58  ;;  %v2322_v23 = vld [vmem:[#allocation10 + $0x10] sm:$0xff]   ;;  %v2324_v25 = vld [vmem:[#allocation10] sm:$0xff]  }
 0x239   : > { %v1986_v27 = vpop.f32.mrf.mxu1  ;;  %2141 = vmatprep.subr.bf16.mxu1 %v2322_v23 }
 0x23a   : > { %v2868_v29 = vadd.f32 %v1985_v26, %v2846_v3  ;;  %2149 = vmatpush3.bf16.msra.mxu1 %v2322_v23 }
 0x23b   : > { %v1987_v31 = vpop.f32.mrf.mxu1  ;;  %2091 = vmatpush3.bf16.msra.mxu0 %v2318_v58  ;;  %2142 = vmatprep.subr.bf16.mxu1 %v2323_v24 }
 0x23c   : > { %v964_v32 = vpack.c.bf16 %v2868_v29, %v2865_v28  ;;  %2092 = vmatprep.subr.bf16.mxu0 %v2319_v59  ;;  %v1988_v34 = vadd.f32 %v1987_v31, %v1986_v27 }
 0x23d   : > { %v1989_v33 = vpop.f32.mrf.mxu1 }
 0x23e   : > { %2076 = vmatprep.mubr.bf16.mxu0 %v964_v32  ;;  %v2873_v38 = vadd.f32 %v1988_v34, %v2846_v3  ;;  %2150 = vmatpush3.bf16.msra.mxu1 %v2323_v24 }
 0x23f   : > { %v1990_v35 = vpop.f32.mrf.mxu1  ;;  %2093 = vmatpush3.bf16.msra.mxu0 %v2319_v59  ;;  %2143 = vmatprep.subr.bf16.mxu1 %v2324_v25 }
 0x240   : > { %v1991_v36 = vadd.f32 %v1990_v35, %v1989_v33  ;;  %2094 = vmatprep.subr.bf16.mxu0 %v2320_v60 }
 0x241   : > { %v1992_v37 = vpop.f32.mrf.mxu1 }
 0x242   : > { %v2876_v39 = vadd.f32 %v1991_v36, %v2846_v3  ;;  %2151 = vmatpush3.bf16.msra.mxu1 %v2324_v25 }
 0x243   : > { %v1993_v40 = vpop.f32.mrf.mxu1  ;;  %2095 = vmatpush3.bf16.msra.mxu0 %v2320_v60 }
 0x244   : > { %v965_v41 = vpack.c.bf16 %v2876_v39, %v2873_v38  ;;  %2096 = vmatprep.subr.bf16.mxu0 %v2321_v61  ;;  %v1994_v43 = vadd.f32 %v1993_v40, %v1992_v37 }
 0x245   : > { %v1995_v42 = vpop.f32.mrf.mxu1 }
 0x246   : > { %2077 = vmatmul.mubr.bf16.gmra.mxu0 %v965_v41  ;;  %v2881_v48 = vadd.f32 %v1994_v43, %v2846_v3 }
 0x247   : > { %v1996_v44 = vpop.f32.mrf.mxu1  ;;  %2097 = vmatpush3.bf16.msra.mxu0 %v2321_v61 }
 0x248   : > { %v1997_v45 = vadd.f32 %v1996_v44, %v1995_v42  ;;  %3398 = vst [vmem:[#allocation19_spill] sm:$0xff] %v2881_v48  ;;  %2098 = vmatprep.subr.bf16.mxu0 %v2322_v23 }
 0x249   : > { %v1998_v47 = vpop.f32.mrf.mxu1 }
 0x24a   : > { %v2884_v49 = vadd.f32 %v1997_v45, %v2846_v3 }
 0x24b   : > { %v1999_v50 = vpop.f32.mrf.mxu1  ;;  %2099 = vmatpush3.bf16.msra.mxu0 %v2322_v23 }
 0x24c   : > { %3399 = vst [vmem:[#allocation20_spill] sm:$0xff] %v2884_v49  ;;  %v966_v51 = vpack.c.bf16 %v2884_v49, %v2881_v48  ;;  %v2000_v53 = vadd.f32 %v1999_v50, %v1998_v47  ;;  %2100 = vmatprep.subr.bf16.mxu0 %v2323_v24 }
 0x24d   : > { %v2001_v52 = vpop.f32.mrf.mxu1 }
 0x24e   : > { %2080 = vmatprep.mubr.bf16.mxu0 %v966_v51  ;;  %v2889_v58 = vadd.f32 %v2000_v53, %v2846_v3 }
 0x24f   : > { %v2002_v55 = vpop.f32.mrf.mxu1  ;;  %2101 = vmatpush3.bf16.msra.mxu0 %v2323_v24 }
 0x250   : > { %v2003_v56 = vadd.f32 %v2002_v55, %v2001_v52  ;;  %3400 = vst [vmem:[#allocation21_spill] sm:$0xff] %v2889_v58  ;;  %2102 = vmatprep.subr.bf16.mxu0 %v2324_v25 }
 0x251   : > { %v2004_v57 = vpop.f32.mrf.mxu1 }
 0x252   : > { %v2892_v59 = vadd.f32 %v2003_v56, %v2846_v3 }
 0x253   : > { %v2005_v60 = vpop.f32.mrf.mxu1  ;;  %2103 = vmatpush3.bf16.msra.mxu0 %v2324_v25 }
 0x254   : > { %3401 = vst [vmem:[#allocation22_spill] sm:$0xff] %v2892_v59  ;;  %v967_v61 = vpack.c.bf16 %v2892_v59, %v2889_v58  ;;  %v2006_v0 = vadd.f32 %v2005_v60, %v2004_v57 }
 0x255   : > { %v2007_v63 = vpop.f32.mrf.mxu1 }
 0x256   : > { %2081 = vmatmul.mubr.bf16.gmra.mxu0 %v967_v61  ;;  %v2897_v5 = vadd.f32 %v2006_v0, %v2846_v3 }
 0x257   : > { %v2008_v1 = vpop.f32.mrf.mxu1 }
 0x258   : > { %v2009_v2 = vadd.f32 %v2008_v1, %v2007_v63  ;;  %3402 = vst [vmem:[#allocation23_spill] sm:$0xff] %v2897_v5 }
 0x259   : > { %v2010_v4 = vpop.f32.mrf.mxu1 }
 0x25a   : > { %v2900_v7 = vadd.f32 %v2009_v2, %v2846_v3 }
 0x25b   : > { %v2011_v10 = vpop.f32.mrf.mxu1 }
 0x25c   : > { %3403 = vst [vmem:[#allocation24_spill] sm:$0xff] %v2900_v7  ;;  %v968_v11 = vpack.c.bf16 %v2900_v7, %v2897_v5  ;;  %v2012_v13 = vadd.f32 %v2011_v10, %v2010_v4 }
 0x25d   : > { %v2013_v12 = vpop.f32.mrf.mxu1 }
 0x25e   : > { %2084 = vmatprep.mubr.bf16.mxu0 %v968_v11  ;;  %v2905_v17 = vadd.f32 %v2012_v13, %v2846_v3 }
 0x25f   : > { %v2014_v15 = vpop.f32.mrf.mxu1 }
 0x260   : > { %v2015_v16 = vadd.f32 %v2014_v15, %v2013_v12  ;;  %3404 = vst [vmem:[#allocation25_spill] sm:$0xff] %v2905_v17 }
 0x262   : > { %v2908_v20 = vadd.f32 %v2015_v16, %v2846_v3 }
 0x264   : > { %3405 = vst [vmem:[#allocation26_spill] sm:$0xff] %v2908_v20  ;;  %v969_v21 = vpack.c.bf16 %v2908_v20, %v2905_v17 }
 0x266   : > { %2085 = vmatmul.mubr.bf16.gmra.mxu0 %v969_v21 }
 0x2f6   : > { %v2912_v3 = vpop.f32.mrf.mxu0 }
 0x2f7   : > { %v1133_v35 = vmul.f32 %v2912_v3, %v2857_v18 }
 0x2f8   : > { %v2914_v26 = vpop.f32.mrf.mxu0 }
 0x2f9   : > { %v1131_v33 = vmul.f32 %v2914_v26, %v2849_v8  ;;  %v1147_v24 = vmul.f32 %v2914_v26, %v2914_v26 }
 0x2fa   : > { %v2916_v27 = vpop.f32.mrf.mxu0 }
 0x2fb   : > { %v1134_v31 = vmul.f32 %v2916_v27, %v2860_v19 }
 0x2fc   : > { %v2920_v32 = vpop.f32.mrf.mxu0 }
 0x2fd   : > { %v1132_v34 = vmul.f32 %v2920_v32, %v2852_v9  ;;  %v1164_v37 = vpack.c.bf16 %v1134_v31, %v1133_v35  ;;  %v1148_v15 = vmul.f32 %v2920_v32, %v2920_v32 }
 0x2ff   : > { %v1163_v36 = vpack.c.bf16 %v1132_v34, %v1131_v33  ;;  %v1171_v33 = vpack.c.bf16 %v1148_v15, %v1147_v24  ;;  %v1150_v34 = vmul.f32 %v2916_v27, %v2916_v27 }
 0x301   : > { %2104 = vmatprep.mubr.bf16.mxu0 %v1163_v36  ;;  %v1149_v36 = vmul.f32 %v2912_v3, %v2912_v3 }
 0x302   : > { %2105 = vmatmul.mubr.bf16.vlgmr.msra.gmra.mxu0 %v1164_v37 }
 0x306   : > { %v2928_v40 = vpop.f32.mrf.mxu0 }
 0x307   : > { %v1137_v50 = vmul.f32 %v2928_v40, %v2873_v38 }
 0x308   : > { %v2930_v41 = vpop.f32.mrf.mxu0 }
 0x309   : > { %v1135_v45 = vmul.f32 %v2930_v41, %v2865_v28  ;;  %v1151_v37 = vmul.f32 %v2930_v41, %v2930_v41 }
 0x30a   : > { %v2932_v42 = vpop.f32.mrf.mxu0 }
 0x30b   : > { %v1138_v43 = vmul.f32 %v2932_v42, %v2876_v39 }
 0x30c   : > { %v2936_v44 = vpop.f32.mrf.mxu0 }
 0x30d   : > { %v1136_v47 = vmul.f32 %v2936_v44, %v2868_v29  ;;  %v1166_v52 = vpack.c.bf16 %v1138_v43, %v1137_v50  ;;  %v1152_v35 = vmul.f32 %v2936_v44, %v2936_v44  ;;  %v1172_v43 = vpack.c.bf16 %v1150_v34, %v1149_v36 }
 0x30f   : > { %v1165_v51 = vpack.c.bf16 %v1136_v47, %v1135_v45  ;;  %v1173_v45 = vpack.c.bf16 %v1152_v35, %v1151_v37  ;;  %v1154_v47 = vmul.f32 %v2932_v42, %v2932_v42 }
 0x311   : > { %2108 = vmatprep.mubr.bf16.mxu0 %v1165_v51  ;;  %v1153_v51 = vmul.f32 %v2928_v40, %v2928_v40 }
 0x312   : > { %2109 = vmatmul.mubr.bf16.gmra.mxu0 %v1166_v52 }
 0x316   : > { %v2944_v53 = vpop.f32.mrf.mxu0 }
 0x317   : > { %v1141_v0 = vmul.f32 %v2944_v53, %v2889_v58 }
 0x318   : > { %v2946_v55 = vpop.f32.mrf.mxu0 }
 0x319   : > { %v1139_v61 = vmul.f32 %v2946_v55, %v2881_v48  ;;  %v1155_v52 = vmul.f32 %v2946_v55, %v2946_v55 }
 0x31a   : > { %v2948_v56 = vpop.f32.mrf.mxu0 }
 0x31b   : > { %3406 = vst [vmem:[#allocation27_spill] sm:$0xff] %v2948_v56  ;;  %v1142_v57 = vmul.f32 %v2948_v56, %v2892_v59 }
 0x31c   : > { %v2952_v60 = vpop.f32.mrf.mxu0 }
 0x31d   : > { %3407 = vst [vmem:[#allocation28_spill] sm:$0xff] %v2952_v60  ;;  %v1140_v63 = vmul.f32 %v2952_v60, %v2884_v49  ;;  %v1168_v2 = vpack.c.bf16 %v1142_v57, %v1141_v0  ;;  %v1156_v50 = vmul.f32 %v2952_v60, %v2952_v60  ;;  %v1174_v57 = vpack.c.bf16 %v1154_v47, %v1153_v51 }
 0x31e   : > { %v3089_v49 = vmul.f32 0.2, %v2881_v48 }
 0x31f   : > { %v1167_v1 = vpack.c.bf16 %v1140_v63, %v1139_v61  ;;  %v1175_v61 = vpack.c.bf16 %v1156_v50, %v1155_v52  ;;  %v1158_v63 = vmul.f32 %v2948_v56, %v2948_v56 }
 0x320   : > { %3418 = vst [vmem:[#allocation39_spill] sm:$0xff] %v3089_v49 }
 0x321   : > { %2112 = vmatprep.mubr.bf16.mxu1 %v1167_v1  ;;  %v1157_v1 = vmul.f32 %v2944_v53, %v2944_v53 }
 0x322   : > { %2113 = vmatmul.mubr.bf16.vlgmr.msra.gmra.mxu1 %v1168_v2 }
 0x326   : > { %v2960_v4 = vpop.f32.mrf.mxu0 }
 0x327   : > { %3408 = vst [vmem:[#allocation29_spill] sm:$0xff] %v2960_v4  ;;  %v1145_v23 = vmul.f32 %v2960_v4, %v2905_v17 }
 0x328   : > { %v2962_v10 = vpop.f32.mrf.mxu0 }
 0x329   : > { %3409 = vst [vmem:[#allocation30_spill] sm:$0xff] %v2962_v10  ;;  %v1143_v16 = vmul.f32 %v2962_v10, %v2897_v5  ;;  %v1159_v2 = vmul.f32 %v2962_v10, %v2962_v10  ;;  %v3075_v5 = vmul.f32 0.2, %v2868_v29 }
 0x32a   : > { %v2964_v11 = vpop.f32.mrf.mxu0 }
 0x32b   : > { %3410 = vst [vmem:[#allocation31_spill] sm:$0xff] %v2964_v11  ;;  %v1146_v12 = vmul.f32 %v2964_v11, %v2908_v20 }
 0x32c   : > { %v2968_v13 = vpop.f32.mrf.mxu0 }
 0x32d   : > { %3411 = vst [vmem:[#allocation32_spill] sm:$0xff] %v2968_v13  ;;  %v1144_v21 = vmul.f32 %v2968_v13, %v2900_v7  ;;  %v1170_v31 = vpack.c.bf16 %v1146_v12, %v1145_v23  ;;  %v1160_v0 = vmul.f32 %v2968_v13, %v2968_v13  ;;  %v1176_v12 = vpack.c.bf16 %v1158_v63, %v1157_v1 }
 0x32f   : > { %v1169_v25 = vpack.c.bf16 %v1144_v21, %v1143_v16  ;;  %v1177_v15 = vpack.c.bf16 %v1160_v0, %v1159_v2  ;;  %v1162_v16 = vmul.f32 %v2964_v11, %v2964_v11  ;;  %v1161_v21 = vmul.f32 %v2960_v4, %v2960_v4 }
 0x330   : > { %v3086_v4 = vmul.f32 0.2, %v2876_v39 }
 0x331   : > { %2116 = vmatprep.mubr.bf16.mxu1 %v1169_v25  ;;  %v1178_v23 = vpack.c.bf16 %v1162_v16, %v1161_v21 }
 0x332   : > { %2117 = vmatmul.mubr.bf16.gmra.mxu1 %v1170_v31 }
 0x333   : > { %2120 = vmatprep.mubr.bf16.mxu1 %v1171_v33 }
 0x33a   : > { %2121 = vmatmul.mubr.bf16.gmra.mxu1 %v1172_v43 }
 0x33b   : > { %2124 = vmatprep.mubr.bf16.mxu1 %v1173_v45 }
 0x342   : > { %2125 = vmatmul.mubr.bf16.gmra.mxu1 %v1174_v57 }
 0x343   : > { %2128 = vmatprep.mubr.bf16.mxu1 %v1175_v61 }
 0x34a   : > { %2129 = vmatmul.mubr.bf16.gmra.mxu1 %v1176_v12 }
 0x34b   : > { %2132 = vmatprep.mubr.bf16.mxu1 %v1177_v15 }
 0x352   : > { %2133 = vmatmul.mubr.bf16.gmra.mxu1 %v1178_v23 }
 0x3c2   : > { %v3024_v52 = vpop.f32.mrf.mxu0 }
 0x3c3   : > { %vm1550_vm0 = vcmp.ge.f32.partialorder %v3024_v52, 0.0 }
 0x3c4   : > { %v3028_v1 = vpop.f32.mrf.mxu0 }
 0x3c5   : > { %vm1548_vm1 = vcmp.ge.f32.partialorder %v3028_v1, 0.0 }
 0x3c6   : > { %v3037_v23 = vpop.f32.mrf.mxu0 }
 0x3c7   : > { %vm1551_vm2 = vcmp.ge.f32.partialorder %v3037_v23, 0.0 }
 0x3c8   : > { %v3062_v20 = vpop.f32.mrf.mxu0 }
 0x3c9   : > { %vm1549_vm3 = vcmp.ge.f32.partialorder %v3062_v20, 0.0 }
 0x3e2   : > { %v3008_v24 = vpop.f32.mrf.mxu1 }
 0x3e3   : > { %vm1558_vm8 = vcmp.ge.f32.partialorder %v3008_v24, 0.0 }
 0x3e4   : > { %v3010_v25 = vpop.f32.mrf.mxu1 }
 0x3e5   : > { %vm1556_vm9 = vcmp.ge.f32.partialorder %v3010_v25, 0.0 }
 0x3e6   : > { %v3012_v31 = vpop.f32.mrf.mxu1 }
 0x3e7   : > { %3412 = vst [vmem:[#allocation33_spill] sm:$0xff] %v3012_v31 }
 0x3e8   : > { %v3014_v33 = vpop.f32.mrf.mxu1 }
 0x3e9   : > { %3413 = vst [vmem:[#allocation34_spill] sm:$0xff] %v3014_v33 }
 0x3f2   : > { %v3016_v34 = vpop.f32.mrf.mxu1 }
 0x3f3   : > { %3414 = vst [vmem:[#allocation35_spill] sm:$0xff] %v3016_v34  ;;  %v3092_v34 = vmul.f32 0.2, %v2889_v58 }
 0x3f4   : > { %v3018_v35 = vpop.f32.mrf.mxu1 }
 0x3f5   : > { %3415 = vst [vmem:[#allocation36_spill] sm:$0xff] %v3018_v35  ;;  %v3078_v35 = vmul.f32 0.2, %v2873_v38  ;;  %3419 = vst [vmem:[#allocation40_spill] sm:$0xff] %v3092_v34 }
 0x3f6   : > { %v3020_v36 = vpop.f32.mrf.mxu1 }
 0x3f7   : > { %3416 = vst [vmem:[#allocation37_spill] sm:$0xff] %v3020_v36  ;;  %v3072_v36 = vmul.f32 0.2, %v2865_v28 }
 0x3f8   : > { %v3022_v37 = vpop.f32.mrf.mxu1 }
 0x3f9   : > { %3417 = vst [vmem:[#allocation38_spill] sm:$0xff] %v3022_v37  ;;  %v3069_v37 = vmul.f32 0.2, %v2860_v19 }
 0x3fa   : > { %v2122_v43 = vpop.f32.mrf.mxu1 }
 0x3fb   : > { %v1406_v45 = vadd.f32 1e-06, %v2122_v43 }
 0x3fc   : > { %v1341_v47 = vpop.f32.mrf.mxu1 }
 0x3fd   : > { %2333 = vrcp.f32 %v1406_v45  ;;  %v1404_v50 = vadd.f32 1e-06, %v1341_v47 }
 0x3fe   : > { %v2123_v51 = vpop.f32.mrf.mxu1 }
 0x3ff   : > { %2335 = vrcp.f32 %v1404_v50  ;;  %v1407_v57 = vadd.f32 1e-06, %v2123_v51  ;;  %v3054_v51 = vmul.f32 0.2, %v2849_v8 }
 0x400   : > { %v1344_v61 = vpop.f32.mrf.mxu1 }
 0x401   : > { %2337 = vrcp.f32 %v1407_v57  ;;  %v3026_v63 = vadd.f32 1e-06, %v1344_v61  ;;  %v3057_v61 = vmul.f32 0.2, %v2852_v9 }
 0x402   : > { %v2126_v0 = vpop.f32.mrf.mxu1 }
 0x403   : > { %2339 = vrcp.f32 %v3026_v63  ;;  %v3031_v2 = vadd.f32 1e-06, %v2126_v0 }
 0x404   : > { %v1357_v12 = vpop.f32.mrf.mxu1 }
 0x405   : > { %2341 = vrcp.f32 %v3031_v2  ;;  %v3034_v15 = vadd.f32 1e-06, %v1357_v12  ;;  %v3060_v12 = vmul.f32 0.2, %v2857_v18 }
 0x406   : > { %v2127_v16 = vpop.f32.mrf.mxu1 }
 0x407   : > { %2343 = vrcp.f32 %v3034_v15  ;;  %v3040_v43 = vadd.f32 1e-06, %v2127_v16 }
 0x408   : > { %v1360_v7 = vpop.f32.mrf.mxu1 }
 0x409   : > { %2345 = vrcp.f32 %v3040_v43  ;;  %v3049_v21 = vadd.f32 1e-06, %v1360_v7 }
 0x40a   : > { %v2334_v13 = vpop.eup %2333  ;;  %v2130_v0 = vpop.f32.mrf.mxu1 }
 0x40b   : > { %v1438_v11 = vmul.f32 %v2334_v13, %v1406_v45  ;;  %2347 = vrcp.f32 %v3049_v21  ;;  %v3065_v7 = vadd.f32 1e-06, %v2130_v0  ;;  %v3080_v45 = vpop.f32.mrf.mxu0 }
 0x40c   : > { %v2336_v16 = vpop.eup %2335  ;;  %v1373_v10 = vpop.f32.mrf.mxu1  ;;  %vm1554_vm4 = vcmp.ge.f32.partialorder %v3080_v45, 0.0 }
 0x40d   : > { %v1454_v0 = vsub.f32 2.0, %v1438_v11  ;;  %v1436_v46 = vmul.f32 %v2336_v16, %v1404_v50  ;;  %v3082_v17 = vadd.f32 1e-06, %v1373_v10  ;;  %2349 = vrcp.f32 %v3065_v7  ;;  %v3102_v30 = vpop.f32.mrf.mxu0 }
 0x40e   : > { %v2338_v47 = vpop.eup %2337  ;;  %v2131_v60 = vpop.f32.mrf.mxu1  ;;  %v3096_v11 = vmul.f32 0.2, %v2892_v59  ;;  %vm1552_vm5 = vcmp.ge.f32.partialorder %v3102_v30, 0.0 }
 0x40f   : > { %v1470_v33 = vmul.f32 %v2334_v13, %v1454_v0  ;;  %v1452_v56 = vsub.f32 2.0, %v1436_v46  ;;  %v1439_v31 = vmul.f32 %v2338_v47, %v1407_v57  ;;  %2351 = vrcp.f32 %v3082_v17  ;;  %v3118_v58 = vpop.f32.mrf.mxu0 }
 0x410   : > { %v2340_v10 = vpop.eup %2339  ;;  %3420 = vst [vmem:[#allocation41_spill] sm:$0xff] %v3096_v11  ;;  %v3100_v50 = vadd.f32 1e-06, %v2131_v60  ;;  %v1376_v22 = vpop.f32.mrf.mxu1  ;;  %vm1555_vm6 = vcmp.ge.f32.partialorder %v3118_v58, 0.0 }
 0x411   : > { %v1486_v49 = vmul.f32 %v3024_v52, %v1470_v33  ;;  %v1468_v13 = vmul.f32 %v2336_v16, %v1452_v56  ;;  %v1455_v46 = vsub.f32 2.0, %v1439_v31  ;;  %v1437_v57 = vmul.f32 %v2340_v10, %v3026_v63 }
 0x412   : > { %v2342_v0 = vpop.eup %2341  ;;  %2353 = vrcp.f32 %v3100_v50  ;;  %v3109_v11 = vadd.f32 1e-06, %v1376_v22  ;;  %v2134_v60 = vpop.f32.mrf.mxu1 }
 0x413   : > { %v1502_v34 = vmul.f32 %v2912_v3, %v1486_v49  ;;  %v1484_v59 = vmul.f32 %v1468_v13, %v3028_v1  ;;  %v1471_v48 = vmul.f32 %v2338_v47, %v1455_v46  ;;  %v1453_v33 = vsub.f32 2.0, %v1437_v57 }
 0x414   : > { %v2344_v56 = vpop.eup %2343  ;;  %v1442_v31 = vmul.f32 %v2342_v0, %v3031_v2  ;;  %2355 = vrcp.f32 %v3109_v11  ;;  %v3116_v63 = vadd.f32 1e-06, %v2134_v60  ;;  %v1389_v16 = vpop.f32.mrf.mxu1 }
 0x415   : > { %v1518_v22 = vsub.f32 %v2857_v18, %v1502_v34  ;;  %v1500_v49 = vmul.f32 %v1484_v59, %v2914_v26  ;;  %v1487_v3 = vmul.f32 %v3037_v23, %v1471_v48  ;;  %v1469_v47 = vmul.f32 %v2340_v10, %v1453_v33 }
 0x416   : > { %v2346_v13 = vpop.eup %2345  ;;  %v1458_v46 = vsub.f32 2.0, %v1442_v31  ;;  %v1440_v57 = vmul.f32 %v2344_v56, %v3034_v15  ;;  %2357 = vrcp.f32 %v3116_v63  ;;  %v3125_v2 = vadd.f32 1e-06, %v1389_v16  ;;  %v3135_v16 = vpop.f32.mrf.mxu0 }
 0x417   : > { %v1566_v60 = vsel %vm1550_vm0, %v2857_v18, %v1518_v22  ;;  %v1516_v34 = vsub.f32 %v2849_v8, %v1500_v49  ;;  %v1503_v59 = vmul.f32 %v2916_v27, %v1487_v3  ;;  %v1485_v48 = vmul.f32 %v1469_v47, %v3062_v20 }
 0x418   : > { %3421 = vst [vmem:[#allocation42_spill] sm:$0xff] %v3125_v2  ;;  %v2348_v26 = vpop.eup %2347  ;;  %v1582_v10 = vmul.f32 0.8, %v1566_v60  ;;  %v1474_v33 = vmul.f32 %v2342_v0, %v1458_v46  ;;  %v1456_v15 = vsub.f32 2.0, %v1440_v57  ;;  %v1443_v31 = vmul.f32 %v2346_v13, %v3040_v43 }
 0x419   : > { %v1564_v2 = vsel %vm1548_vm1, %v2849_v8, %v1516_v34  ;;  %v1519_v18 = vsub.f32 %v2860_v19, %v1503_v59  ;;  %v1501_v52 = vmul.f32 %v1485_v48, %v2920_v32  ;;  %v1441_v27 = vmul.f32 %v2348_v26, %v3049_v21 }
 0x41a   : > { %v1598_v22 = vadd.f32 %v1582_v10, %v3060_v12  ;;  %v1580_v0 = vmul.f32 0.8, %v1564_v2  ;;  %v1490_v49 = vmul.f32 %v3080_v45, %v1474_v33  ;;  %v1472_v43 = vmul.f32 %v2344_v56, %v1456_v15  ;;  %v2350_v32 = vpop.eup %2349 }
 0x41b   : > { %v1567_v3 = vsel %vm1551_vm2, %v2860_v19, %v1519_v18  ;;  %v1517_v8 = vsub.f32 %v2852_v9, %v1501_v52  ;;  %v1459_v1 = vsub.f32 2.0, %v1443_v31  ;;  %v1457_v47 = vsub.f32 2.0, %v1441_v27 }
 0x41c   : > { %vm1553_vm7 = vcmp.ge.f32.partialorder %v3135_v16, 0.0  ;;  %v3422_v21 = vunpack.c.l.bf16 %v2819_v62  ;;  %v1596_v46 = vadd.f32 %v1580_v0, %v3054_v51  ;;  %v1583_v56 = vmul.f32 0.8, %v1567_v3  ;;  %v2352_v23 = vpop.eup %2351 }
 0x41d   : > { %v1506_v57 = vmul.f32 %v2928_v40, %v1490_v49  ;;  %v1565_v19 = vsel %vm1549_vm3, %v2852_v9, %v1517_v8  ;;  %v1488_v2 = vmul.f32 %v1472_v43, %v3102_v30  ;;  %v1475_v60 = vmul.f32 %v2346_v13, %v1459_v1 }
 0x41e   : > { %v1630_v12 = vadd.f32 %v3422_v21, %v1598_v22  ;;  %v1473_v34 = vmul.f32 %v2348_v26, %v1457_v47  ;;  %v3423_v51 = vunpack.c.l.bf16 %v2815_v54  ;;  %v1599_v40 = vadd.f32 %v1583_v56, %v3069_v37 }
 0x41f   : > { %v1581_v48 = vmul.f32 0.8, %v1565_v19  ;;  %v1522_v10 = vsub.f32 %v2873_v38, %v1506_v57  ;;  %v2354_v9 = vpop.eup %2353  ;;  %v1504_v20 = vmul.f32 %v1488_v2, %v2930_v41  ;;  %v1491_v13 = vmul.f32 %v3118_v58, %v1475_v60 }
 0x420   : > { %1646 = vst [vmem:[%s3162_s30 + $0x10] sm:$0xff] %v1630_v12  ;;  %v1628_v59 = vadd.f32 %v3423_v51, %v1596_v46  ;;  %v1489_v26 = vmul.f32 %v1473_v34, %v3135_v16  ;;  %v1446_v33 = vmul.f32 %v2350_v32, %v3065_v7  ;;  %v3424_v15 = vunpack.c.h.bf16 %v2819_v62  ;;  %v2135_v12 = vpop.f32.mrf.mxu1  ;;  %v3428_v34 = vld [vmem:[#allocation33_spill] sm:$0xff] }
 0x421   : > { %v1597_v18 = vadd.f32 %v1581_v48, %v3057_v61  ;;  %v1570_v37 = vsel %vm1554_vm4, %v2873_v38, %v1522_v10  ;;  %v1444_v52 = vmul.f32 %v2352_v23, %v3082_v17  ;;  %v2356_v27 = vpop.eup %2355  ;;  %v1520_v22 = vsub.f32 %v2865_v28, %v1504_v20  ;;  %v3431_v20 = vld [vmem:[#allocation21_spill] sm:$0xff] }
 0x422   : > { %1644 = vst [vmem:[%s3162_s30] sm:$0xff] %v1628_v59  ;;  %v1631_v31 = vadd.f32 %v3424_v15, %v1599_v40  ;;  %v1586_v41 = vmul.f32 0.8, %v1570_v37  ;;  %v1507_v0 = vmul.f32 %v2932_v42, %v1491_v13  ;;  %v1505_v7 = vmul.f32 %v1489_v26, %v2936_v44  ;;  %v1392_v48 = vpop.f32.mrf.mxu1  ;;  %v3432_v13 = vld [vmem:[#allocation42_spill] sm:$0xff] }
 0x423   : > { %v3425_v62 = vunpack.c.h.bf16 %v2815_v54  ;;  %v1462_v61 = vsub.f32 2.0, %v1446_v33  ;;  %v1460_v43 = vsub.f32 2.0, %v1444_v52  ;;  %v1447_v45 = vmul.f32 %v2354_v9, %v3100_v50  ;;  %v2358_v38 = vpop.eup %2357  ;;  %v3435_v15 = vld [vmem:[#allocation34_spill] sm:$0xff] }
 0x424   : > { %1647 = vst [vmem:[%s3162_s30 + $0x18] sm:$0xff] %v1631_v31  ;;  %v1602_v17 = vadd.f32 %v1586_v41, %v3078_v35  ;;  %v1568_v3 = vsel %vm1552_vm5, %v2865_v28, %v1520_v22  ;;  %v1523_v42 = vsub.f32 %v2876_v39, %v1507_v0  ;;  %v1521_v44 = vsub.f32 %v2868_v29, %v1505_v7  ;;  %v3436_v41 = vld [vmem:[#allocation22_spill] sm:$0xff]  ;;  %v3437_v0 = vld [vmem:[#allocation28_spill] sm:$0xff] }
 0x425   : > { %v1629_v49 = vadd.f32 %v3425_v62, %v1597_v18  ;;  %v1584_v54 = vmul.f32 0.8, %v1568_v3  ;;  %v1478_v8 = vmul.f32 %v2350_v32, %v1462_v61  ;;  %v1476_v1 = vmul.f32 %v2352_v23, %v1460_v43  ;;  %v3439_v61 = vld [vmem:[#allocation40_spill] sm:$0xff] }
 0x426   : > { %v1463_v47 = vsub.f32 2.0, %v1447_v45  ;;  %v3426_v50 = vunpack.c.l.bf16 %v2827_v14  ;;  %v1571_v35 = vsel %vm1555_vm6, %v2876_v39, %v1523_v42  ;;  %v1569_v30 = vsel %vm1553_vm7, %v2868_v29, %v1521_v44  ;;  %v3440_v45 = vld [vmem:[#allocation20_spill] sm:$0xff]  ;;  %v3442_v44 = vld [vmem:[#allocation29_spill] sm:$0xff] }
 0x427   : > { %1645 = vst [vmem:[%s3162_s30 + $0x8] sm:$0xff] %v1629_v49  ;;  %v1445_v28 = vmul.f32 %v2356_v27, %v3109_v11  ;;  %v1600_v46 = vadd.f32 %v1584_v54, %v3072_v36  ;;  %v1587_v56 = vmul.f32 0.8, %v1571_v35  ;;  %v1585_v32 = vmul.f32 0.8, %v1569_v30  ;;  %v3438_v49 = vld [vmem:[#allocation35_spill] sm:$0xff] }
 0x428   : > { %v1634_v21 = vadd.f32 %v3426_v50, %v1602_v17  ;;  %v1494_v57 = vmul.f32 %v3008_v24, %v1478_v8  ;;  %v1492_v23 = vmul.f32 %v1476_v1, %v3010_v25  ;;  %v1479_v19 = vmul.f32 %v2354_v9, %v1463_v47  ;;  %v3441_v17 = vld [vmem:[#allocation39_spill] sm:$0xff]  ;;  %v3443_v8 = vld [vmem:[#allocation16_spill] sm:$0xff]  ;;  %v3444_v50 = vld [vmem:[#allocation17_spill] sm:$0xff] }
 0x429   : > { %v1461_v58 = vsub.f32 2.0, %v1445_v28  ;;  %v1450_v39 = vmul.f32 %v2358_v38, %v3116_v63  ;;  %v3427_v16 = vunpack.c.l.bf16 %v2823_v6  ;;  %v1603_v11 = vadd.f32 %v1587_v56, %v3086_v4 }
 0x42a   : > { %1650 = vst [vmem:[%s3162_s30 + $0x30] sm:$0xff] %v1634_v21  ;;  %v1601_v2 = vadd.f32 %v1585_v32, %v3075_v5  ;;  %v1510_v36 = vmul.f32 %v2944_v53, %v1494_v57  ;;  %v1508_v60 = vmul.f32 %v1492_v23, %v2946_v55  ;;  %v1495_v51 = vmul.f32 %v3428_v34, %v1479_v19  ;;  %v3433_v53 = vld [vmem:[#allocation19_spill] sm:$0xff]  ;;  %v3448_v57 = vld [vmem:[#allocation25_spill] sm:$0xff] }
 0x42b   : > { %v1632_v29 = vadd.f32 %v3427_v16, %v1600_v46  ;;  %v1477_v59 = vmul.f32 %v2356_v27, %v1461_v58  ;;  %v1466_v40 = vsub.f32 2.0, %v1450_v39  ;;  %v3429_v63 = vunpack.c.h.bf16 %v2827_v14  ;;  %v3434_v55 = vld [vmem:[#allocation27_spill] sm:$0xff]  ;;  %v3447_v46 = vld [vmem:[#allocation41_spill] sm:$0xff] }
 0x42c   : > { %v3430_v9 = vunpack.c.h.bf16 %v2823_v6  ;;  %v1526_v5 = vsub.f32 %v3431_v20, %v1510_v36  ;;  %2359 = vrcp.f32 %v3432_v13  ;;  %v1524_v26 = vsub.f32 %v3433_v53, %v1508_v60 }
 0x42d   : > { %1648 = vst [vmem:[%s3162_s30 + $0x20] sm:$0xff] %v1632_v29  ;;  %v1635_v10 = vadd.f32 %v3429_v63, %v1603_v11  ;;  %v1511_v33 = vmul.f32 %v3434_v55, %v1495_v51  ;;  %v1493_v31 = vmul.f32 %v1477_v59, %v3435_v15  ;;  %v1482_v18 = vmul.f32 %v2358_v38, %v1466_v40  ;;  %v3450_v29 = vld [vmem:[#allocation18_spill] sm:$0xff] }
 0x42e   : > { %v1633_v4 = vadd.f32 %v3430_v9, %v1601_v2  ;;  %v1574_v6 = vsel %vm1558_vm8, %v3431_v20, %v1526_v5  ;;  %v1419_v14 = vadd.f32 1e-06, %v2135_v12  ;;  %v1417_v37 = vadd.f32 1e-06, %v1392_v48  ;;  %v3451_v5 = vld [vmem:[#allocation36_spill] sm:$0xff] }
 0x42f   : > { %1651 = vst [vmem:[%s3162_s30 + $0x38] sm:$0xff] %v1635_v10  ;;  %v1590_v52 = vmul.f32 0.8, %v1574_v6  ;;  %v1572_v27 = vsel %vm1556_vm9, %v3433_v53, %v1524_v26  ;;  %v1527_v22 = vsub.f32 %v3436_v41, %v1511_v33  ;;  %v1509_v7 = vmul.f32 %v1493_v31, %v3437_v0  ;;  %v3452_v33 = vld [vmem:[#allocation30_spill] sm:$0xff]  ;;  %v3453_v6 = vld [vmem:[#allocation23_spill] sm:$0xff] }
 0x430   : > { %1649 = vst [vmem:[%s3162_s30 + $0x28] sm:$0xff] %v1633_v4  ;;  %vm1559_vm10 = vcmp.ge.f32.partialorder %v3428_v34, 0.0  ;;  %v1588_v62 = vmul.f32 0.8, %v1572_v27  ;;  %v1498_v25 = vmul.f32 %v3438_v49, %v1482_v18  ;;  %2361 = vrcp.f32 %v1419_v14 }
 0x431   : > { %v1606_v43 = vadd.f32 %v1590_v52, %v3439_v61  ;;  %v1575_v24 = vsel %vm1559_vm10, %v3436_v41, %v1527_v22  ;;  %v1525_v38 = vsub.f32 %v3440_v45, %v1509_v7  ;;  %2363 = vrcp.f32 %v1417_v37  ;;  %v3454_v52 = vld [vmem:[#allocation37_spill] sm:$0xff]  ;;  %v3455_v41 = vld [vmem:[#allocation38_spill] sm:$0xff]  ;;  %v3457_v61 = vld [vmem:[#allocation32_spill] sm:$0xff] }
 0x432   : > { %vm1557_vm11 = vcmp.ge.f32.partialorder %v3435_v15, 0.0  ;;  %v1604_v3 = vadd.f32 %v1588_v62, %v3441_v17  ;;  %v1591_v42 = vmul.f32 0.8, %v1575_v24  ;;  %v1514_v54 = vmul.f32 %v3442_v44, %v1498_v25  ;;  %v2365_v7 = vld [vmem:[%s2812_s10 + $0x30] sm:$0xff]   ;;  %v3459_v17 = vld [vmem:[#allocation24_spill] sm:$0xff] }
 0x433   : > { %v1621_v1 = vunpack.c.h.bf16 %v3443_v8  ;;  %v1541_v47 = vmul.f32 0.2, %v3440_v45  ;;  %v3445_v21 = vunpack.c.l.bf16 %v3444_v50  ;;  %v1573_v30 = vsel %vm1557_vm11, %v3440_v45, %v1525_v38  ;;  %v3458_v24 = vld [vmem:[#allocation26_spill] sm:$0xff] }
 0x434   : > { %v3446_v28 = vunpack.c.l.bf16 %v3443_v8  ;;  %v1607_v56 = vadd.f32 %v1591_v42, %v3447_v46  ;;  %v1589_v32 = vmul.f32 0.8, %v1573_v30  ;;  %v1530_v23 = vsub.f32 %v3448_v57, %v1514_v54  ;;  %v2366_v42 = vld [vmem:[%s2812_s10 + $0x38] sm:$0xff]  }
 0x435   : > { %v1638_v35 = vadd.f32 %v3445_v21, %v1606_v43  ;;  %vm1562_vm12 = vcmp.ge.f32.partialorder %v3438_v49, 0.0  ;;  %v3449_v19 = vunpack.c.h.bf16 %v3444_v50  ;;  %v1626_v11 = vunpack.c.l.bf16 %v3450_v29 }
 0x436   : > { %v1636_v12 = vadd.f32 %v3446_v28, %v1604_v3  ;;  %v1605_v39 = vadd.f32 %v1589_v32, %v1541_v47  ;;  %v1578_v16 = vsel %vm1562_vm12, %v3448_v57, %v1530_v23  ;;  %v1546_v2 = vmul.f32 0.2, %v3448_v57 }
 0x437   : > { %1654 = vst [vmem:[%s3162_s30 + $0x50] sm:$0xff] %v1638_v35  ;;  %v1639_v58 = vadd.f32 %v3449_v19, %v1607_v56  ;;  %v1594_v36 = vmul.f32 0.8, %v1578_v16  ;;  %vm1560_vm13 = vcmp.ge.f32.partialorder %v3451_v5, 0.0  ;;  %v1624_v62 = vunpack.c.l.bf16 %v2365_v7 }
 0x438   : > { %1652 = vst [vmem:[%s3162_s30 + $0x40] sm:$0xff] %v1636_v12  ;;  %v1637_v60 = vadd.f32 %v1621_v1, %v1605_v39  ;;  %v1544_v49 = vmul.f32 0.2, %v3453_v6  ;;  %vm1563_vm14 = vcmp.ge.f32.partialorder %v3454_v52, 0.0  ;;  %v1627_v44 = vunpack.c.h.bf16 %v2366_v42 }
 0x439   : > { %1655 = vst [vmem:[%s3162_s30 + $0x58] sm:$0xff] %v1639_v58  ;;  %v2360_v34 = vpop.eup %2359  ;;  %v1610_v51 = vadd.f32 %v1594_v36, %v1546_v2  ;;  %vm1561_vm15 = vcmp.ge.f32.partialorder %v3455_v41, 0.0  ;;  %v1547_v8 = vmul.f32 0.2, %v3458_v24  ;;  %v1625_v21 = vunpack.c.h.bf16 %v2365_v7 }
 0x43a   : > { %1653 = vst [vmem:[%s3162_s30 + $0x48] sm:$0xff] %v1637_v60  ;;  %v1448_v59 = vmul.f32 %v2360_v34, %v3432_v13  ;;  %v1545_v35 = vmul.f32 0.2, %v3459_v17 }
 0x43b   : > { %v1642_v40 = vadd.f32 %v1626_v11, %v1610_v51 }
 0x43c   : > { %v1464_v48 = vsub.f32 2.0, %v1448_v59 }
 0x43d   : > { %v2362_v63 = vpop.eup %2361  ;;  %1658 = vst [vmem:[%s3162_s30 + $0x70] sm:$0xff] %v1642_v40 }
 0x43e   : > { %v2364_v10 = vpop.eup %2363  ;;  %v1480_v9 = vmul.f32 %v2360_v34, %v1464_v48  ;;  %v1451_v4 = vmul.f32 %v2362_v63, %v1419_v14 }
 0x43f   : > { %v1449_v20 = vmul.f32 %v2364_v10, %v1417_v37  ;;  %v3456_v37 = vld [vmem:[#allocation31_spill] sm:$0xff] }
 0x440   : > { %v1496_v53 = vmul.f32 %v1480_v9, %v3451_v5  ;;  %v1467_v26 = vsub.f32 2.0, %v1451_v4 }
 0x441   : > { %v1465_v55 = vsub.f32 2.0, %v1449_v20 }
 0x442   : > { %v1512_v15 = vmul.f32 %v1496_v53, %v3452_v33  ;;  %v1483_v31 = vmul.f32 %v2362_v63, %v1467_v26 }
 0x443   : > { %v1481_v18 = vmul.f32 %v2364_v10, %v1465_v55 }
 0x444   : > { %v1528_v13 = vsub.f32 %v3453_v6, %v1512_v15  ;;  %v1499_v27 = vmul.f32 %v3454_v52, %v1483_v31 }
 0x445   : > { %v1497_v22 = vmul.f32 %v1481_v18, %v3455_v41 }
 0x446   : > { %v1576_v14 = vsel %vm1560_vm13, %v3453_v6, %v1528_v13  ;;  %v1515_v0 = vmul.f32 %v3456_v37, %v1499_v27 }
 0x447   : > { %v1592_v25 = vmul.f32 0.8, %v1576_v14  ;;  %v1513_v43 = vmul.f32 %v1497_v22, %v3457_v61 }
 0x448   : > { %v1531_v45 = vsub.f32 %v3458_v24, %v1515_v0 }
 0x449   : > { %v1608_v38 = vadd.f32 %v1592_v25, %v1544_v49  ;;  %v1529_v3 = vsub.f32 %v3459_v17, %v1513_v43 }
 0x44a   : > { %v1579_v54 = vsel %vm1563_vm14, %v3458_v24, %v1531_v45 }
 0x44b   : > { %v1640_v1 = vadd.f32 %v1624_v62, %v1608_v38  ;;  %v1595_v47 = vmul.f32 0.8, %v1579_v54  ;;  %v1577_v50 = vsel %vm1561_vm15, %v3459_v17, %v1529_v3 }
 0x44c   : > { %v1593_v30 = vmul.f32 0.8, %v1577_v50 }
 0x44d   : > { %1656 = vst [vmem:[%s3162_s30 + $0x60] sm:$0xff] %v1640_v1  ;;  %v1611_v28 = vadd.f32 %v1595_v47, %v1547_v8 }
 0x44e   : > { %v1609_v12 = vadd.f32 %v1593_v30, %v1545_v35 }
 0x44f   : > { %v1643_v46 = vadd.f32 %v1627_v44, %v1611_v28 }
 0x450   : > { %v1641_v56 = vadd.f32 %v1625_v21, %v1609_v12 }
 0x451   : > { %1659 = vst [vmem:[%s3162_s30 + $0x78] sm:$0xff] %v1643_v46 }
 0x452   : > { %1657 = vst [vmem:[%s3162_s30 + $0x68] sm:$0xff] %v1641_v56 }
 0x453   : > { %2512 = shalt.err (!%p2509_p5)
}
 0x454   : > { %s2513_s7 = scalar_lea.hbm %s3291_s14, 2048  ;;  %s2517_s12 = scalar_lea.hbm %s3344_s6, 4096 }
 0x455   : > { %p2514_p3 = scmp.ne.s32.totalorder %s3291_s14, %s2513_s7  ;;  %p2518_p8 = scmp.lt.s32.totalorder %s3291_s14, %s3344_s6 }
 0x456   : > { %p2519_p9 = scmp.lt.s32.totalorder %s2517_s12, %s2513_s7 }
 0x457   : > { %p2515_p4 = pnand %p2514_p3, %p3460_p12 }
 0x458   : > { %p2520_p2 = por %p2519_p9, %p2518_p8 }
 0x459   : > { %p2516_p6 = pneg %p2515_p4 }
 0x45b   : > { %p2521_p10 = pnand %p2520_p2, %p2516_p6 }
 0x45d   : > { %2524 = shalt.err (!%p2521_p10)
}
 0x45e   : > { %s2583_s13 = smov 128   ;;  %s2584_s17 = smov 8  }
 0x45f   : > { %2170 = dma.vmem_to_hbm [thread:$0]  (%p3460_p12), %s3293_s8, 2048, %s3291_s14, %s1661_s15, %s2583_s13, %s2583_s13, %s2584_s17  }
 0x460 PF: > { %s1689_s25 = sand.u32 1, %s2559_s21   ;;  %p3461_p7 = scmp.ne.s32.totalorder %s3384_s28, 0 }
 0x461   : > { %p3462_p1 = scmp.ge.s32.totalorder %s2571_s24, 2  ;;  %s1690_s20 = scalar_lea.sflag [#allocation4], %s1689_s25 }
 0x463   : > { %p2190_p13 = pnand %p3462_p1, %p3461_p7 }
 0x465   : > { %p2191_p0 = pneg %p2190_p13 }
 0x467   : > { %2554 = dma.done.wait (%p2191_p0), %s1690_s20, 2048  }
 0x468   : > { %2556 = vsyncadd (%p2191_p0), %s1690_s20, 4294965248  ;;  %p21_p11 = scmp.ge.s32.totalorder %s2720_s16, 4   ;;  %s3463_s21 = smov %s2563_s22 }
 0x469   : > { %s3464_s22 = smov %s2567_s23  ;;  %s3465_s23 = smov %s2736_s19 }
 0x46a   : > { %s3466_s24 = smov %s2720_s16  ;;  %23 = sbr.rel (!%p21_p11) target bundleno = 7 (0x7), region = 106 }
 0x46f   :  { %1695 = vsyncpa [#allocation3], 1 }
 0x470   :  { %1697 = vsyncpa [#allocation3 + $0x1], 1 }
 0x471   :  { %1698 = vsyncpa [#allocation6], 1 }
 0x472   :  { %1699 = vsyncpa [#allocation9], 1 }
 0x473   :  { %1700 = vsyncpa [#allocation4], 1 }
 0x474   :  { %1702 = vsyncpa [#allocation4 + $0x1], 1 }

</bundles_post_ra>
